<compile_context>
chip_gen: v6e
topology: v6e:2x2x1
jax: 0.10.0
libtpu: 0.0.40
codegen_flags: <defaults>
</compile_context>

<pallas_src>
import math

import jax
import jax.numpy as jnp
import numpy as np
from jax.experimental import pallas as pl
from jax.experimental.pallas import tpu as pltpu

OUT_DIM = 3  # final layer width in the module


# ----------------------------------------------------------------------------
# Pallas kernel: whole forward pass for one tile of TN batch rows.
# ----------------------------------------------------------------------------
def net_kernel(
    x_ref,              # (TN, D)            f32
    w1_ref, b1_ref,     # (D, H)       f32,  (1, H)       f32
    w2_ref, b2_ref,     # (H, H)       bf16, (1, H)       f32
    w3_ref, b3_ref,     # (H, H)       bf16, (1, H)       f32
    w4_ref, b4_ref,     # (H, H)       bf16, (1, H)       f32
    w5_ref, b5_ref,     # (H, OUT_DIM) bf16, (1, OUT_DIM) f32
    o_ref,              # (TN, OUT_DIM)      f32
):
    x = x_ref[...]                                   # (TN, D)
    tn, d = x.shape

    # --- layer 1: K = input_dim is tiny -> broadcast FMAs on the VPU
    #     (no systolic fill/drain for a K=3 MXU pass; d is static at trace time).
    w1 = w1_ref[...]                                 # (D, H)
    h = jnp.broadcast_to(b1_ref[...], (tn, w1.shape[1]))
    for k in range(d):
        h = h + x[:, k:k + 1] * w1[k:k + 1, :]
    h = jnp.maximum(h, 0.0)

    # --- layers 2..4: bf16 MXU matmuls with f32 accumulation, f32 bias+ReLU tail.
    for w_ref, b_ref in ((w2_ref, b2_ref), (w3_ref, b3_ref), (w4_ref, b4_ref)):
        h = jnp.dot(h.astype(jnp.bfloat16), w_ref[...],
                    preferred_element_type=jnp.float32) + b_ref[...]
        h = jnp.maximum(h, 0.0)

    # --- layer 5: narrow (H, 3) head straight to the true 3-wide output,
    #     then sigmoid. No 128-column padding / post-call slice needed.
    logits = jnp.dot(h.astype(jnp.bfloat16), w5_ref[...],
                     preferred_element_type=jnp.float32) + b5_ref[...]
    o_ref[...] = jax.nn.sigmoid(logits).astype(o_ref.dtype)


# ----------------------------------------------------------------------------
# One-time parameter prep (hoisted out of the per-call path): bf16 casts for
# the MXU layers; layer-1 weight and all biases stay f32.
# ----------------------------------------------------------------------------
def prepare_params(params):
    return dict(
        w1=params["w1_t"].astype(jnp.float32), b1=params["b1"].astype(jnp.float32),
        w2=params["w2_t"].astype(jnp.bfloat16), b2=params["b2"].astype(jnp.float32),
        w3=params["w3_t"].astype(jnp.bfloat16), b3=params["b3"].astype(jnp.float32),
        w4=params["w4_t"].astype(jnp.bfloat16), b4=params["b4"].astype(jnp.float32),
        w5=params["w5_t"].astype(jnp.bfloat16), b5=params["b5"].astype(jnp.float32),
    )


def _pick_tile_n(n):
    # Keep >= 2 grid steps (v7x has 2 TensorCores; "parallel" only shards with
    # >= 2 steps) while growing tiles up to 2048 rows for large batches to
    # amortize the ~0.35us fixed cost per grid step. 2048 rows is ~5-6 MiB of
    # VMEM including double-buffering -> comfortably inside the 32 MiB limit.
    if n <= 16:
        return max(8, (n // 8) * 8 if n >= 8 else n)
    tile = min(2048, pl.next_power_of_2(n) // 2)
    return max(8, tile)


# ----------------------------------------------------------------------------
# Wrapper: tile over the batch dimension only; all weights fully VMEM-resident.
# ----------------------------------------------------------------------------
def net_forward(x, prepped, tile_n=None):
    N, D = x.shape
    H = prepped["w1"].shape[1]

    if tile_n is None:
        tile_n = _pick_tile_n(N)
    tile_n = max(8, min(int(tile_n), 2048))
    tile_n = (tile_n // 8) * 8                      # sublane multiple

    n_tiles = pl.cdiv(N, tile_n)
    padded_n = n_tiles * tile_n
    x_in = x if padded_n == N else jnp.pad(x, ((0, padded_n - N), (0, 0)))

    args = [prepped["w1"], prepped["b1"], prepped["w2"], prepped["b2"],
            prepped["w3"], prepped["b3"], prepped["w4"], prepped["b4"],
            prepped["w5"], prepped["b5"]]

    def whole(a):
        nd = a.ndim
        return pl.BlockSpec(a.shape, lambda i, _nd=nd: (0,) * _nd)

    in_specs = [pl.BlockSpec((tile_n, D), lambda i: (i, 0))] + [whole(a) for a in args]
    out_spec = pl.BlockSpec((tile_n, OUT_DIM), lambda i: (i, 0))

    # Cheap scheduling hint for XLA around the custom call.
    flops = int(2 * padded_n * (D * H + 3 * H * H + H * OUT_DIM))
    bytes_accessed = int(x_in.size * 4
                         + sum(int(a.size) * a.dtype.itemsize for a in args)
                         + padded_n * OUT_DIM * 4)
    cost = pl.CostEstimate(flops=flops,
                           transcendentals=int(padded_n * OUT_DIM),
                           bytes_accessed=bytes_accessed)

    out = pl.pallas_call(
        net_kernel,
        out_shape=jax.ShapeDtypeStruct((padded_n, OUT_DIM), jnp.float32),
        grid_spec=pltpu.PrefetchScalarGridSpec(
            num_scalar_prefetch=0,
            grid=(n_tiles,),
            in_specs=in_specs,
            out_specs=out_spec,
        ),
        compiler_params=pltpu.CompilerParams(
            # Batch tiles are fully independent -> megacore sharding on v7x.
            dimension_semantics=("parallel",),
            # Safe on v5e / v6e / v7x; revisit only if tile_n grows past ~4096.
            vmem_limit_bytes=32 * 1024 * 1024,
        ),
        cost_estimate=cost,
    )(x_in, *args)

    return out if padded_n == N else out[:N]


# ----------------------------------------------------------------------------
# Pure-JAX reference (mirrors the PyTorch forward exactly, all f32).
# ----------------------------------------------------------------------------
def net_reference(x, p):
    h = jnp.maximum(x @ p["w1_t"] + p["b1"], 0.0)
    h = jnp.maximum(h @ p["w2_t"] + p["b2"], 0.0)
    h = jnp.maximum(h @ p["w3_t"] + p["b3"], 0.0)
    h = jnp.maximum(h @ p["w4_t"] + p["b4"], 0.0)
    return jax.nn.sigmoid(h @ p["w5_t"] + p["b5"])


# ----------------------------------------------------------------------------
# Deterministic parameter init matching torch.nn.Linear defaults:
# W, b ~ U(-1/sqrt(fan_in), 1/sqrt(fan_in)). Stored transposed as (in, out).
# ----------------------------------------------------------------------------
def init_params(key, input_dim, hidden):
    def linear(k, in_d, out_d):
        kw, kb = jax.random.split(k)
        bound = 1.0 / math.sqrt(in_d)
        w = jax.random.uniform(kw, (out_d, in_d), jnp.float32, -bound, bound)
        b = jax.random.uniform(kb, (out_d,), jnp.float32, -bound, bound)
        return w.T, b[None, :]

    ks = jax.random.split(key, 5)
    w1, b1 = linear(ks[0], input_dim, hidden)
    w2, b2 = linear(ks[1], hidden, hidden)
    w3, b3 = linear(ks[2], hidden, hidden)
    w4, b4 = linear(ks[3], hidden, hidden)
    w5, b5 = linear(ks[4], hidden, OUT_DIM)
    return dict(w1_t=w1, b1=b1, w2_t=w2, b2=b2, w3_t=w3, b3=b3,
                w4_t=w4, b4=b4, w5_t=w5, b5=b5)


if __name__ == "__main__":
    key = jax.random.PRNGKey(0)
    kx, kp = jax.random.split(key)

    input_dim, hidden = 3, 128   # small shapes consistent with the module
    N = 512                      # batch of 3-D coordinates

    x = jax.random.uniform(kx, (N, input_dim), jnp.float32, -1.0, 1.0)
    params = init_params(kp, input_dim, hidden)
    prepped = prepare_params(params)   # one-time bf16 prep, outside the hot path

    out = net_forward(x, prepped)      # default tile_n=256 -> grid=(2,), parallel
    out = jax.block_until_ready(out)
    assert out.shape == (N, OUT_DIM)

    ref = net_reference(x, params)
    # bf16 weights/activations with f32 accumulation vs. the f32 reference.
    np.testing.assert_allclose(np.asarray(out), np.asarray(ref), rtol=2e-2, atol=2e-2)

    print("KERNEL_OK")
</pallas_src>

<mosaic_0001>
module attributes {stable_mosaic.version = 11 : i64} {
  func.func @net_kernel(%arg0: i32, %arg1: memref<256x3xf32, #tpu.memory_space<vmem>>, %arg2: memref<3x128xf32, #tpu.memory_space<vmem>>, %arg3: memref<1x128xf32, #tpu.memory_space<vmem>>, %arg4: memref<128x128xbf16, #tpu.memory_space<vmem>>, %arg5: memref<1x128xf32, #tpu.memory_space<vmem>>, %arg6: memref<128x128xbf16, #tpu.memory_space<vmem>>, %arg7: memref<1x128xf32, #tpu.memory_space<vmem>>, %arg8: memref<128x128xbf16, #tpu.memory_space<vmem>>, %arg9: memref<1x128xf32, #tpu.memory_space<vmem>>, %arg10: memref<128x3xbf16, #tpu.memory_space<vmem>>, %arg11: memref<1x3xf32, #tpu.memory_space<vmem>>, %arg12: memref<256x3xf32, #tpu.memory_space<vmem>>) attributes {dimension_semantics = [#tpu.dimension_semantics<parallel>], iteration_bounds = array<i64: 2>, scalar_prefetch = 0 : i64, scratch_operands = 0 : i64, tpu.core_type = #tpu.core_type<tc>, window_params = [{transform_indices = @transform_0, window_bounds = array<i64: 256, 3>}, {pipeline_mode = #tpu.pipeline_mode<synchronous>, transform_indices = @transform_1, window_bounds = array<i64: 3, 128>}, {pipeline_mode = #tpu.pipeline_mode<synchronous>, transform_indices = @transform_2, window_bounds = array<i64: 1, 128>}, {pipeline_mode = #tpu.pipeline_mode<synchronous>, transform_indices = @transform_3, window_bounds = array<i64: 128, 128>}, {pipeline_mode = #tpu.pipeline_mode<synchronous>, transform_indices = @transform_4, window_bounds = array<i64: 1, 128>}, {pipeline_mode = #tpu.pipeline_mode<synchronous>, transform_indices = @transform_5, window_bounds = array<i64: 128, 128>}, {pipeline_mode = #tpu.pipeline_mode<synchronous>, transform_indices = @transform_6, window_bounds = array<i64: 1, 128>}, {pipeline_mode = #tpu.pipeline_mode<synchronous>, transform_indices = @transform_7, window_bounds = array<i64: 128, 128>}, {pipeline_mode = #tpu.pipeline_mode<synchronous>, transform_indices = @transform_8, window_bounds = array<i64: 1, 128>}, {pipeline_mode = #tpu.pipeline_mode<synchronous>, transform_indices = @transform_9, window_bounds = array<i64: 128, 3>}, {pipeline_mode = #tpu.pipeline_mode<synchronous>, transform_indices = @transform_10, window_bounds = array<i64: 1, 3>}, {transform_indices = @transform_11, window_bounds = array<i64: 256, 3>}]} {
    %c0 = arith.constant 0 : index
    %c0_0 = arith.constant 0 : index
    %0 = vector.load %arg1[%c0, %c0_0] : memref<256x3xf32, #tpu.memory_space<vmem>>, vector<256x3xf32>
    %c0_1 = arith.constant 0 : index
    %c0_2 = arith.constant 0 : index
    %1 = vector.load %arg2[%c0_1, %c0_2] : memref<3x128xf32, #tpu.memory_space<vmem>>, vector<3x128xf32>
    %c0_3 = arith.constant 0 : index
    %c0_4 = arith.constant 0 : index
    %2 = vector.load %arg3[%c0_3, %c0_4] : memref<1x128xf32, #tpu.memory_space<vmem>>, vector<1x128xf32>
    %3 = vector.shape_cast %2 : vector<1x128xf32> to vector<1x128xf32>
    %4 = vector.broadcast %3 : vector<1x128xf32> to vector<256x128xf32>
    %5 = vector.extract_strided_slice %0 {offsets = [0, 0], sizes = [256, 1], strides = [1, 1]} : vector<256x3xf32> to vector<256x1xf32>
    %6 = vector.extract_strided_slice %1 {offsets = [0, 0], sizes = [1, 128], strides = [1, 1]} : vector<3x128xf32> to vector<1x128xf32>
    %7 = vector.broadcast %5 : vector<256x1xf32> to vector<256x128xf32>
    %8 = vector.broadcast %6 : vector<1x128xf32> to vector<256x128xf32>
    %9 = arith.mulf %7, %8 : vector<256x128xf32>
    %10 = arith.addf %4, %9 : vector<256x128xf32>
    %11 = vector.extract_strided_slice %0 {offsets = [0, 1], sizes = [256, 1], strides = [1, 1]} : vector<256x3xf32> to vector<256x1xf32>
    %12 = vector.extract_strided_slice %1 {offsets = [1, 0], sizes = [1, 128], strides = [1, 1]} : vector<3x128xf32> to vector<1x128xf32>
    %13 = vector.broadcast %11 : vector<256x1xf32> to vector<256x128xf32>
    %14 = vector.broadcast %12 : vector<1x128xf32> to vector<256x128xf32>
    %15 = arith.mulf %13, %14 : vector<256x128xf32>
    %16 = arith.addf %10, %15 : vector<256x128xf32>
    %17 = vector.extract_strided_slice %0 {offsets = [0, 2], sizes = [256, 1], strides = [1, 1]} : vector<256x3xf32> to vector<256x1xf32>
    %18 = vector.extract_strided_slice %1 {offsets = [2, 0], sizes = [1, 128], strides = [1, 1]} : vector<3x128xf32> to vector<1x128xf32>
    %19 = vector.broadcast %17 : vector<256x1xf32> to vector<256x128xf32>
    %20 = vector.broadcast %18 : vector<1x128xf32> to vector<256x128xf32>
    %21 = arith.mulf %19, %20 : vector<256x128xf32>
    %22 = arith.addf %16, %21 : vector<256x128xf32>
    %cst = arith.constant 0.000000e+00 : f32
    %23 = vector.broadcast %cst : f32 to vector<256x128xf32>
    %24 = arith.maximumf %22, %23 : vector<256x128xf32>
    %25 = arith.truncf %24 : vector<256x128xf32> to vector<256x128xbf16>
    %c0_5 = arith.constant 0 : index
    %c0_6 = arith.constant 0 : index
    %26 = vector.load %arg4[%c0_5, %c0_6] : memref<128x128xbf16, #tpu.memory_space<vmem>>, vector<128x128xbf16>
    %cst_7 = arith.constant dense<0.000000e+00> : vector<256x128xf32>
    %27 = tpu.matmul %25, %26, %cst_7 {dimension_numbers = #tpu.dot_dimension_numbers<[1], [0], [0], [1], [0, 0, 1, 1], [], []>} : vector<256x128xbf16>, vector<128x128xbf16>, vector<256x128xf32> -> vector<256x128xf32>
    %c0_8 = arith.constant 0 : index
    %c0_9 = arith.constant 0 : index
    %28 = vector.load %arg5[%c0_8, %c0_9] : memref<1x128xf32, #tpu.memory_space<vmem>>, vector<1x128xf32>
    %29 = vector.broadcast %28 : vector<1x128xf32> to vector<256x128xf32>
    %30 = arith.addf %27, %29 : vector<256x128xf32>
    %cst_10 = arith.constant 0.000000e+00 : f32
    %31 = vector.broadcast %cst_10 : f32 to vector<256x128xf32>
    %32 = arith.maximumf %30, %31 : vector<256x128xf32>
    %33 = arith.truncf %32 : vector<256x128xf32> to vector<256x128xbf16>
    %c0_11 = arith.constant 0 : index
    %c0_12 = arith.constant 0 : index
    %34 = vector.load %arg6[%c0_11, %c0_12] : memref<128x128xbf16, #tpu.memory_space<vmem>>, vector<128x128xbf16>
    %cst_13 = arith.constant dense<0.000000e+00> : vector<256x128xf32>
    %35 = tpu.matmul %33, %34, %cst_13 {dimension_numbers = #tpu.dot_dimension_numbers<[1], [0], [0], [1], [0, 0, 1, 1], [], []>} : vector<256x128xbf16>, vector<128x128xbf16>, vector<256x128xf32> -> vector<256x128xf32>
    %c0_14 = arith.constant 0 : index
    %c0_15 = arith.constant 0 : index
    %36 = vector.load %arg7[%c0_14, %c0_15] : memref<1x128xf32, #tpu.memory_space<vmem>>, vector<1x128xf32>
    %37 = vector.broadcast %36 : vector<1x128xf32> to vector<256x128xf32>
    %38 = arith.addf %35, %37 : vector<256x128xf32>
    %cst_16 = arith.constant 0.000000e+00 : f32
    %39 = vector.broadcast %cst_16 : f32 to vector<256x128xf32>
    %40 = arith.maximumf %38, %39 : vector<256x128xf32>
    %41 = arith.truncf %40 : vector<256x128xf32> to vector<256x128xbf16>
    %c0_17 = arith.constant 0 : index
    %c0_18 = arith.constant 0 : index
    %42 = vector.load %arg8[%c0_17, %c0_18] : memref<128x128xbf16, #tpu.memory_space<vmem>>, vector<128x128xbf16>
    %cst_19 = arith.constant dense<0.000000e+00> : vector<256x128xf32>
    %43 = tpu.matmul %41, %42, %cst_19 {dimension_numbers = #tpu.dot_dimension_numbers<[1], [0], [0], [1], [0, 0, 1, 1], [], []>} : vector<256x128xbf16>, vector<128x128xbf16>, vector<256x128xf32> -> vector<256x128xf32>
    %c0_20 = arith.constant 0 : index
    %c0_21 = arith.constant 0 : index
    %44 = vector.load %arg9[%c0_20, %c0_21] : memref<1x128xf32, #tpu.memory_space<vmem>>, vector<1x128xf32>
    %45 = vector.broadcast %44 : vector<1x128xf32> to vector<256x128xf32>
    %46 = arith.addf %43, %45 : vector<256x128xf32>
    %cst_22 = arith.constant 0.000000e+00 : f32
    %47 = vector.broadcast %cst_22 : f32 to vector<256x128xf32>
    %48 = arith.maximumf %46, %47 : vector<256x128xf32>
    %49 = arith.truncf %48 : vector<256x128xf32> to vector<256x128xbf16>
    %c0_23 = arith.constant 0 : index
    %c0_24 = arith.constant 0 : index
    %50 = vector.load %arg10[%c0_23, %c0_24] : memref<128x3xbf16, #tpu.memory_space<vmem>>, vector<128x3xbf16>
    %cst_25 = arith.constant dense<0.000000e+00> : vector<256x3xf32>
    %51 = tpu.matmul %49, %50, %cst_25 {dimension_numbers = #tpu.dot_dimension_numbers<[1], [0], [0], [1], [0, 0, 1, 1], [], []>} : vector<256x128xbf16>, vector<128x3xbf16>, vector<256x3xf32> -> vector<256x3xf32>
    %c0_26 = arith.constant 0 : index
    %c0_27 = arith.constant 0 : index
    %52 = vector.load %arg11[%c0_26, %c0_27] : memref<1x3xf32, #tpu.memory_space<vmem>>, vector<1x3xf32>
    %53 = vector.broadcast %52 : vector<1x3xf32> to vector<256x3xf32>
    %54 = arith.addf %51, %53 : vector<256x3xf32>
    %55 = arith.negf %54 : vector<256x3xf32>
    %56 = math.exp %55 : vector<256x3xf32>
    %cst_28 = arith.constant 1.000000e+00 : f32
    %57 = vector.broadcast %cst_28 : f32 to vector<256x3xf32>
    %58 = arith.addf %57, %56 : vector<256x3xf32>
    %59 = arith.divf %57, %58 : vector<256x3xf32>
    %c0_29 = arith.constant 0 : index
    %c0_30 = arith.constant 0 : index
    %60 = vector.load %arg12[%c0_29, %c0_30] : memref<256x3xf32, #tpu.memory_space<vmem>>, vector<256x3xf32>
    tpu.vector_store %arg12[%c0_29, %c0_30], %59 {strides = array<i32>} : memref<256x3xf32, #tpu.memory_space<vmem>>, vector<256x3xf32>,
    return
  }
  func.func @transform_0(%arg0: i32) -> (i32, i32) {
    %c0_i32 = arith.constant 0 : i32
    %c0_i32_0 = arith.constant 0 : i32
    return %arg0, %c0_i32 : i32, i32
  }
  func.func @transform_1(%arg0: i32) -> (i32, i32) {
    %c0_i32 = arith.constant 0 : i32
    %c0_i32_0 = arith.constant 0 : i32
    %c0_i32_1 = arith.constant 0 : i32
    return %c0_i32, %c0_i32_0 : i32, i32
  }
  func.func @transform_2(%arg0: i32) -> (i32, i32) {
    %c0_i32 = arith.constant 0 : i32
    %c0_i32_0 = arith.constant 0 : i32
    %c0_i32_1 = arith.constant 0 : i32
    return %c0_i32, %c0_i32_0 : i32, i32
  }
  func.func @transform_3(%arg0: i32) -> (i32, i32) {
    %c0_i32 = arith.constant 0 : i32
    %c0_i32_0 = arith.constant 0 : i32
    %c0_i32_1 = arith.constant 0 : i32
    return %c0_i32, %c0_i32_0 : i32, i32
  }
  func.func @transform_4(%arg0: i32) -> (i32, i32) {
    %c0_i32 = arith.constant 0 : i32
    %c0_i32_0 = arith.constant 0 : i32
    %c0_i32_1 = arith.constant 0 : i32
    return %c0_i32, %c0_i32_0 : i32, i32
  }
  func.func @transform_5(%arg0: i32) -> (i32, i32) {
    %c0_i32 = arith.constant 0 : i32
    %c0_i32_0 = arith.constant 0 : i32
    %c0_i32_1 = arith.constant 0 : i32
    return %c0_i32, %c0_i32_0 : i32, i32
  }
  func.func @transform_6(%arg0: i32) -> (i32, i32) {
    %c0_i32 = arith.constant 0 : i32
    %c0_i32_0 = arith.constant 0 : i32
    %c0_i32_1 = arith.constant 0 : i32
    return %c0_i32, %c0_i32_0 : i32, i32
  }
  func.func @transform_7(%arg0: i32) -> (i32, i32) {
    %c0_i32 = arith.constant 0 : i32
    %c0_i32_0 = arith.constant 0 : i32
    %c0_i32_1 = arith.constant 0 : i32
    return %c0_i32, %c0_i32_0 : i32, i32
  }
  func.func @transform_8(%arg0: i32) -> (i32, i32) {
    %c0_i32 = arith.constant 0 : i32
    %c0_i32_0 = arith.constant 0 : i32
    %c0_i32_1 = arith.constant 0 : i32
    return %c0_i32, %c0_i32_0 : i32, i32
  }
  func.func @transform_9(%arg0: i32) -> (i32, i32) {
    %c0_i32 = arith.constant 0 : i32
    %c0_i32_0 = arith.constant 0 : i32
    %c0_i32_1 = arith.constant 0 : i32
    return %c0_i32, %c0_i32_0 : i32, i32
  }
  func.func @transform_10(%arg0: i32) -> (i32, i32) {
    %c0_i32 = arith.constant 0 : i32
    %c0_i32_0 = arith.constant 0 : i32
    %c0_i32_1 = arith.constant 0 : i32
    return %c0_i32, %c0_i32_0 : i32, i32
  }
  func.func @transform_11(%arg0: i32) -> (i32, i32) {
    %c0_i32 = arith.constant 0 : i32
    %c0_i32_0 = arith.constant 0 : i32
    return %arg0, %c0_i32 : i32, i32
  }
}

</mosaic_0001>

<bundles_post_ra>
// kernel: tpu_custom_call.1
= control target key start
LH: loop header
LB: loop body
LE: loop exit
PB: predicated region body
PF: predicated region fallthrough
CT: control target
= control target key end

     0   :  { %s3091_s17 = smov 0   ;;  %s3805_s0 = inlined_call_operand.vmem [shape: f32[512,3], index: 0, kind: input, shape index: {}]   ;;  %s3806_s1 = inlined_call_operand.vmem [shape: f32[3,128], index: 1, kind: input, shape index: {}]   ;;  %s3807_s2 = inlined_call_operand.vmem [shape: f32[1,128], index: 2, kind: input, shape index: {}]   ;;  %s3808_s3 = inlined_call_operand.vmem [shape: bf16[128,128], index: 3, kind: input, shape index: {}]   ;;  %s3809_s4 = inlined_call_operand.vmem [shape: f32[1,128], index: 4, kind: input, shape index: {}]   ;;  %s3810_s5 = inlined_call_operand.vmem [shape: bf16[128,128], index: 5, kind: input, shape index: {}]   ;;  %s3811_s6 = inlined_call_operand.vmem [shape: f32[1,128], index: 6, kind: input, shape index: {}]   ;;  %s3812_s7 = inlined_call_operand.vmem [shape: bf16[128,128], index: 7, kind: input, shape index: {}]   ;;  %s3813_s8 = inlined_call_operand.vmem [shape: f32[1,128], index: 8, kind: input, shape index: {}]   ;;  %s3814_s9 = inlined_call_operand.vmem [shape: bf16[128,3], index: 9, kind: input, shape index: {}]   ;;  %s3815_s10 = inlined_call_operand.vmem [shape: f32[1,3], index: 10, kind: input, shape index: {}]   ;;  %s3816_s11 = inlined_call_operand.vmem [shape: f32[512,3], index: 11, kind: output, shape index: {}]  }
   0x1 LB: > { %s2452_s18 = sadd.s32 4294967295, %s3026_s17   ;;  %p2456_p0 = scmp.ge.s32.totalorder %s3026_s17, 1  ;;  %s3026_s17 = sphi %s3091_s17, %s21_s17  }
   0x2   : > { %p338_p1 = scmp.lt.s32.totalorder %s3026_s17, 3 }
   0x4   : > { %p339_p2 = pnand %p2456_p0, %p338_p1 }
   0x5   : > { %s2457_s19 = sshll.u32 (!%p339_p2), %s2452_s18, 5 }
   0x6   : > { %342 = sbr.rel (%p339_p2) target bundleno = 1254 (0x4e6), region = 64  ;;  %p379_p3 = scmp.lt.s32.totalorder (!%p339_p2), %s2457_s19, 63 }
   0xb   : > { %v3028_v0 = vmov 1   ;;  %v3029_v1 = vmov 0   ;;  %s3818_s19 = smov (!%p379_p3, %s2457_s19), 63  ;;  %v3030_v9 = vmov 2   ;;  %v2860_v16 = vld [vmem:[%s3808_s3 + $0x38] sm:$0xff]   ;;  %v2861_v18 = vld [vmem:[%s3808_s3 + $0x30] sm:$0xff]  }
   0xc   : > { %2832 = vset.pattern.permute.xlu0 %v3028_v0  ;;  %2831 = vset.pattern.permute.xlu1 %v3029_v1  ;;  %s2458_s20 = sshll.u32 %s3818_s19, 3  ;;  %v2862_v20 = vld [vmem:[%s3808_s3 + $0x28] sm:$0xff]   ;;  %v2863_v22 = vld [vmem:[%s3808_s3 + $0x20] sm:$0xff]   ;;  %v2864_v24 = vld [vmem:[%s3808_s3 + $0x18] sm:$0xff]   ;;  %vm2363_vm0 = vcmask 23552  }
   0xd   : > { %s3109_s23 = scalar_lea.vmem %s3805_s0, %s2458_s20  ;;  %2628 = vmatprep.subr.bf16.mxu0 %v2860_v16  ;;  %v2865_v25 = vld [vmem:[%s3808_s3 + $0x10] sm:$0xff]   ;;  %v2866_v27 = vld [vmem:[%s3808_s3 + $0x8] sm:$0xff]   ;;  %v2867_v28 = vld [vmem:[%s3808_s3] sm:$0xff]   ;;  %s3716_s22 = scalar_lea.vmem %s3816_s11, %s2458_s20 }
   0xe   : > { %v393_v2 = vld [vmem:[%s3109_s23 + $0x10] sm:$0xff]  ;;  %v3113_v3 = vld [vmem:[%s3109_s23] sm:$0xff]  ;;  %v394_v4 = vld [vmem:[%s3109_s23 + $0x18] sm:$0xff]  ;;  %2629 = vmatpush3.bf16.msra.mxu0 %v2860_v16 }
   0xf   : > { %443 = vperm.xlu1 %2831, %v393_v2   ;;  %660 = vperm.xlu0 %2832, %v3113_v3   ;;  %v396_v5 = vld [vmem:[%s3109_s23 + $0x28] sm:$0xff]  ;;  %v3122_v7 = vld [vmem:[%s3109_s23 + $0x40] sm:$0xff]  ;;  %v3127_v8 = vld [vmem:[%s3109_s23 + $0x58] sm:$0xff] }
  0x10   : > { %v3119_v6 = vld [vmem:[%s3109_s23 + $0x8] sm:$0xff]  ;;  %v395_v10 = vld [vmem:[%s3109_s23 + $0x20] sm:$0xff]  ;;  %v398_v11 = vld [vmem:[%s3109_s23 + $0x38] sm:$0xff]  ;;  %2630 = vmatprep.subr.bf16.mxu0 %v2861_v18 }
  0x11   : > { %v400_v12 = vld [vmem:[%s3109_s23 + $0x48] sm:$0xff]  ;;  %v397_v13 = vld [vmem:[%s3109_s23 + $0x30] sm:$0xff]  ;;  %v3141_v14 = vld [vmem:[%s3109_s23 + $0x60] sm:$0xff] }
  0x12   : > { %v3145_v15 = vld [vmem:[%s3109_s23 + $0x78] sm:$0xff]  ;;  %v3153_v17 = vld [vmem:[%s3109_s23 + $0x88] sm:$0xff]  ;;  %v3160_v19 = vld [vmem:[%s3109_s23 + $0xa0] sm:$0xff]  ;;  %2631 = vmatpush3.bf16.msra.mxu0 %v2861_v18 }
  0x13   : > { %448 = vperm.xlu1 %2831, %v394_v4   ;;  %672 = vperm.xlu0 %2832, %v394_v4   ;;  %v3167_v21 = vld [vmem:[%s3109_s23 + $0xb8] sm:$0xff]  ;;  %v3175_v23 = vld [vmem:[%s3109_s23 + $0xc8] sm:$0xff]  ;;  %v401_v26 = vld [vmem:[%s3109_s23 + $0x50] sm:$0xff] }
  0x14   : > { %2632 = vmatprep.subr.bf16.mxu0 %v2862_v20  ;;  %v404_v29 = vld [vmem:[%s3109_s23 + $0x68] sm:$0xff]  ;;  %v405_v30 = vld [vmem:[%s3109_s23 + $0x70] sm:$0xff]  ;;  %v3211_v31 = vld [vmem:[%s3109_s23 + $0xe0] sm:$0xff] }
  0x15   : > { %v3217_v32 = vld [vmem:[%s3109_s23 + $0xf8] sm:$0xff]  ;;  %v407_v33 = vld [vmem:[%s3109_s23 + $0x80] sm:$0xff]  ;;  %v3230_v37 = vld [vmem:[%s3109_s23 + $0xa8] sm:$0xff] }
  0x16   : > { %2633 = vmatpush3.bf16.msra.mxu0 %v2862_v20  ;;  %v410_v34 = vld [vmem:[%s3109_s23 + $0x98] sm:$0xff]  ;;  %v409_v40 = vld [vmem:[%s3109_s23 + $0x90] sm:$0xff]  ;;  %v3240_v41 = vld [vmem:[%s3109_s23 + $0xc0] sm:$0xff] }
  0x17   : > { %2833 = vset.pattern.permute.xlu1 %v3028_v0  ;;  %680 = vperm.xlu0 %2832, %v396_v5   ;;  %v3248_v44 = vld [vmem:[%s3109_s23 + $0xd8] sm:$0xff]  ;;  %v3256_v47 = vld [vmem:[%s3109_s23 + $0xe8] sm:$0xff]  ;;  %v413_v61 = vld [vmem:[%s3109_s23 + $0xb0] sm:$0xff] }
  0x18   : > { %664 = vperm.xlu1 %2833, %v3119_v6   ;;  %2634 = vmatprep.subr.bf16.mxu0 %v2863_v22  ;;  %v3315_v20 = vld [vmem:[%s3807_s2] ss:$0 sm:$0xff] }
  0x1a   : > { %2635 = vmatpush3.bf16.msra.mxu0 %v2863_v22 }
  0x1b   : > { %692 = vperm.xlu0 %2832, %v3122_v7   ;;  %2636 = vmatprep.subr.bf16.mxu0 %v2864_v24 }
  0x1c   : > { %668 = vperm.xlu1 %2833, %v393_v2  }
  0x1e   : > { %2637 = vmatpush3.bf16.msra.mxu0 %v2864_v24 }
  0x1f   : > { %704 = vperm.xlu0 %2832, %v3127_v8   ;;  %2638 = vmatprep.subr.bf16.mxu0 %v2865_v25 }
  0x20   : > { %2834 = vset.pattern.permute.xlu1 %v3030_v9 }
  0x21   : > { %856 = vperm.xlu1 %2834, %v3113_v3  }
  0x22   : > { %2639 = vmatpush3.bf16.msra.mxu0 %v2865_v25 }
  0x23   : > { %2840 = vset.pattern.permute.xlu0 %v3030_v9  ;;  %2640 = vmatprep.subr.bf16.mxu0 %v2866_v27 }
  0x24   : > { %860 = vperm.xlu0 %2840, %v3119_v6  }
  0x25   : > { %864 = vperm.xlu1 %2834, %v393_v2   ;;  %v591_v2 = vlaneseq }
  0x26   : > { %2641 = vmatpush3.bf16.msra.mxu0 %v2866_v27 }
  0x27   : > { %2642 = vmatprep.subr.bf16.mxu0 %v2867_v28 }
  0x28   : > { %872 = vperm.xlu0 %2840, %v395_v10  }
  0x29   : > { %868 = vperm.xlu1 %2834, %v394_v4  }
  0x2a   : > { %2643 = vmatpush3.bf16.msra.mxu0 %v2867_v28 }
  0x2c   : > { %884 = vperm.xlu0 %2840, %v398_v11  }
  0x2d   : > { %2835 = vset.pattern.permute.xlu1 %v3029_v1 }
  0x2e   : > { %458 = vperm.xlu1 %2835, %v396_v5  }
  0x30   : > { %892 = vperm.xlu0 %2840, %v400_v12  }
  0x32   : > { %463 = vperm.xlu1 %2835, %v397_v13  }
  0x34   : > { %904 = vperm.xlu0 %2840, %v3141_v14  }
  0x36   : > { %2836 = vset.pattern.permute.xlu1 %v3028_v0 }
  0x37   : > { %676 = vperm.xlu1 %2836, %v395_v10  }
  0x38   : > { %916 = vperm.xlu0 %2840, %v3145_v15  }
  0x3b   : > { %684 = vperm.xlu1 %2836, %v397_v13  }
  0x3c   : > { %924 = vperm.xlu0 %2840, %v3153_v17  }
  0x3f   : > { %688 = vperm.xlu1 %2836, %v398_v11  }
  0x40   : > { %936 = vperm.xlu0 %2840, %v3160_v19  }
  0x43   : > { %2837 = vset.pattern.permute.xlu1 %v3030_v9 }
  0x44   : > { %876 = vperm.xlu1 %2837, %v396_v5   ;;  %948 = vperm.xlu0 %2840, %v3167_v21   ;;  %v592_v5 = vshrl.u32 %v591_v2, 7 }
  0x48   : > { %880 = vperm.xlu1 %2837, %v397_v13   ;;  %956 = vperm.xlu0 %2840, %v3175_v23  }
  0x4c   : > { %2838 = vset.pattern.permute.xlu1 %v3029_v1  ;;  %2854 = vset.pattern.permute.xlu0 %v3029_v1 }
  0x4d   : > { %473 = vperm.xlu1 %2838, %v3122_v7   ;;  %433 = vperm.xlu0 %2854, %v3113_v3  }
  0x51   : > { %483 = vperm.xlu1 %2838, %v401_v26   ;;  %438 = vperm.xlu0 %2854, %v3119_v6  }
  0x55   : > { %488 = vperm.xlu1 %2838, %v3127_v8   ;;  %453 = vperm.xlu0 %2854, %v395_v10   ;;  %v423_v10 = vld [vmem:[%s3806_s1] sm:$0x7] }
  0x59   : > { %2839 = vset.pattern.permute.xlu1 %v3028_v0  ;;  %468 = vperm.xlu0 %2854, %v398_v11   ;;  %v789_v11 = vsub.s32 1, %v592_v5 }
  0x5a   : > { %696 = vperm.xlu1 %2839, %v400_v12  }
  0x5d   : > { %478 = vperm.xlu0 %2854, %v400_v12  }
  0x5e   : > { %700 = vperm.xlu1 %2839, %v401_v26  }
  0x61   : > { %493 = vperm.xlu0 %2854, %v3141_v14  }
  0x62   : > { %2841 = vset.pattern.permute.xlu1 %v3030_v9 }
  0x63   : > { %888 = vperm.xlu1 %2841, %v3122_v7  }
  0x65   : > { %508 = vperm.xlu0 %2854, %v3145_v15  }
  0x67   : > { %896 = vperm.xlu1 %2841, %v401_v26  }
  0x69   : > { %518 = vperm.xlu0 %2854, %v3153_v17  }
  0x6b   : > { %900 = vperm.xlu1 %2841, %v3127_v8   ;;  %v593_v8 = vsub.s32 0, %v592_v5 }
  0x6d   : > { %533 = vperm.xlu0 %2854, %v3160_v19  }
  0x6f   : > { %2842 = vset.pattern.permute.xlu1 %v3029_v1 }
  0x70   : > { %498 = vperm.xlu1 %2842, %v404_v29  }
  0x71   : > { %548 = vperm.xlu0 %2854, %v3167_v21  }
  0x74   : > { %503 = vperm.xlu1 %2842, %v405_v30  }
  0x75   : > { %558 = vperm.xlu0 %2854, %v3175_v23  }
  0x78   : > { %2843 = vset.pattern.permute.xlu1 %v3028_v0 }
  0x79   : > { %708 = vperm.xlu1 %2843, %v3141_v14   ;;  %573 = vperm.xlu0 %2854, %v3211_v31   ;;  %v3304_v14 = vrot.slane %v423_v10, %v593_v8 }
  0x7d   : > { %716 = vperm.xlu1 %2843, %v405_v30   ;;  %588 = vperm.xlu0 %2854, %v3217_v32  }
  0x81   : > { %720 = vperm.xlu1 %2843, %v3145_v15   ;;  %2856 = vset.pattern.permute.xlu0 %v3028_v0  ;;  %v3306_v15 = vrot.slane %v423_v10, %v789_v11 }
  0x82   : > { %712 = vperm.xlu0 %2856, %v404_v29  }
  0x85   : > { %2844 = vset.pattern.permute.xlu1 %v3030_v9 }
  0x86   : > { %908 = vperm.xlu1 %2844, %v404_v29   ;;  %724 = vperm.xlu0 %2856, %v407_v33  }
  0x8a   : > { %v3225_v35 = vpop.permute.xlu1 %443  ;;  %912 = vperm.xlu1 %2844, %v405_v30   ;;  %v3227_v36 = vpop.permute.xlu0 %660  ;;  %736 = vperm.xlu0 %2856, %v410_v34  }
  0x8b   : > { %v791_v22 = vmul.f32 %v3306_v15, %v3227_v36 }
  0x8e   : > { %v3232_v38 = vpop.permute.xlu1 %448  ;;  %2845 = vset.pattern.permute.xlu1 %v3029_v1  ;;  %v3235_v39 = vpop.permute.xlu0 %672  ;;  %744 = vperm.xlu0 %2856, %v3230_v37  }
  0x8f   : > { %513 = vperm.xlu1 %2845, %v407_v33   ;;  %v598_v16 = vmul.f32 %v3304_v14, %v3232_v38  ;;  %v794_v26 = vmul.f32 %v3306_v15, %v3235_v39 }
  0x91   : > { %v630_v25 = vadd.f32 %v3315_v20, %v598_v16 }
  0x92   : > { %v3242_v42 = vpop.permute.xlu0 %680  ;;  %756 = vperm.xlu0 %2856, %v3240_v41  }
  0x93   : > { %v3245_v43 = vpop.permute.xlu1 %664  ;;  %523 = vperm.xlu1 %2845, %v409_v40   ;;  %v826_v39 = vadd.f32 %v794_v26, %v630_v25 }
  0x96   : > { %v3250_v45 = vpop.permute.xlu0 %692  ;;  %768 = vperm.xlu0 %2856, %v3248_v44  }
  0x97   : > { %v3253_v46 = vpop.permute.xlu1 %668  ;;  %528 = vperm.xlu1 %2845, %v410_v34  }
  0x98   : > { %v793_v30 = vmul.f32 %v3306_v15, %v3253_v46 }
  0x9a   : > { %v3258_v48 = vpop.permute.xlu0 %704  ;;  %776 = vperm.xlu0 %2856, %v3256_v47  }
  0x9b   : > { %2846 = vset.pattern.permute.xlu1 %v3028_v0 }
  0x9c   : > { %728 = vperm.xlu1 %2846, %v3153_v17   ;;  %v3263_v49 = vpop.permute.xlu1 %856  ;;  %v985_v17 = vsub.s32 2, %v592_v5 }
  0x9e   : > { %2858 = vset.pattern.permute.xlu0 %v3030_v9  ;;  %v3325_v27 = vrot.slane %v423_v10, %v985_v17 }
  0x9f   : > { %v3266_v50 = vpop.permute.xlu0 %860  ;;  %968 = vperm.xlu0 %2858, %v3211_v31  }
  0xa0   : > { %732 = vperm.xlu1 %2846, %v409_v40   ;;  %v3269_v51 = vpop.permute.xlu1 %864  ;;  %v988_v2 = vmul.f32 %v3325_v27, %v3266_v50 }
  0xa3   : > { %v3271_v52 = vpop.permute.xlu0 %872  ;;  %980 = vperm.xlu0 %2858, %v3217_v32  }
  0xa4   : > { %2847 = vset.pattern.permute.xlu1 %v3030_v9  ;;  %v869_v53 = vpop.permute.xlu1 %868 }
  0xa5   : > { %920 = vperm.xlu1 %2847, %v407_v33   ;;  %v990_v33 = vmul.f32 %v3325_v27, %v869_v53  ;;  %v792_v53 = vmul.f32 %v3306_v15, %v3245_v43 }
  0xa7   : > { %v3275_v54 = vpop.permute.xlu0 %884  ;;  %v1022_v10 = vadd.f32 %v990_v33, %v826_v39 }
  0xa9   : > { %928 = vperm.xlu1 %2847, %v409_v40   ;;  %v459_v55 = vpop.permute.xlu1 %458  ;;  %v796_v40 = vmul.f32 %v3306_v15, %v3242_v42  ;;  %v1054_v26 = vmax.f32 %v1022_v10, 0.0 }
  0xaa   : > { %v600_v28 = vmul.f32 %v3304_v14, %v459_v55  ;;  %v989_v55 = vmul.f32 %v3325_v27, %v3269_v51 }
  0xab   : > { %v3277_v56 = vpop.permute.xlu0 %892 }
  0xac   : > { %v632_v46 = vadd.f32 %v3315_v20, %v600_v28 }
  0xad   : > { %932 = vperm.xlu1 %2847, %v410_v34   ;;  %v464_v57 = vpop.permute.xlu1 %463 }
  0xae   : > { %v601_v42 = vmul.f32 %v3304_v14, %v464_v57  ;;  %v991_v57 = vmul.f32 %v3325_v27, %v3271_v52 }
  0xaf   : > { %v3279_v58 = vpop.permute.xlu0 %904 }
  0xb0   : > { %v633_v28 = vadd.f32 %v3315_v20, %v601_v42 }
  0xb1   : > { %2848 = vset.pattern.permute.xlu1 %v3029_v1 }
  0xb2   : > { %538 = vperm.xlu1 %2848, %v3230_v37   ;;  %v3283_v59 = vpop.permute.xlu1 %676 }
  0xb3   : > { %v3285_v60 = vpop.permute.xlu0 %916 }
  0xb6   : > { %543 = vperm.xlu1 %2848, %v413_v61   ;;  %v685_v62 = vpop.permute.xlu1 %684 }
  0xb7   : > { %v3288_v63 = vpop.permute.xlu0 %924 }
  0xba   : > { %2849 = vset.pattern.permute.xlu1 %v3028_v0  ;;  %v3291_v3 = vpop.permute.xlu1 %688 }
  0xbb   : > { %740 = vperm.xlu1 %2849, %v3160_v19   ;;  %v3294_v4 = vpop.permute.xlu0 %936 }
  0xbf   : > { %748 = vperm.xlu1 %2849, %v413_v61   ;;  %v877_v6 = vpop.permute.xlu1 %876  ;;  %v3296_v7 = vpop.permute.xlu0 %948 }
  0xc0   : > { %v992_v51 = vmul.f32 %v3325_v27, %v877_v6  ;;  %v795_v6 = vmul.f32 %v3306_v15, %v3283_v59  ;;  %v994_v59 = vmul.f32 %v3325_v27, %v3275_v54 }
  0xc3   : > { %752 = vperm.xlu1 %2849, %v3167_v21   ;;  %v881_v12 = vpop.permute.xlu1 %880  ;;  %v3302_v13 = vpop.permute.xlu0 %956  ;;  %v597_v21 = vmul.f32 %v3304_v14, %v3225_v35 }
  0xc5   : > { %v629_v36 = vadd.f32 %v3315_v20, %v597_v21  ;;  %v828_v21 = vadd.f32 %v796_v40, %v632_v46 }
  0xc7   : > { %2850 = vset.pattern.permute.xlu1 %v3030_v9  ;;  %v825_v8 = vadd.f32 %v793_v30, %v629_v36  ;;  %v993_v30 = vmul.f32 %v3325_v27, %v881_v12 }
  0xc8   : > { %940 = vperm.xlu1 %2850, %v3230_v37   ;;  %v474_v18 = vpop.permute.xlu1 %473  ;;  %v434_v19 = vpop.permute.xlu0 %433 }
  0xc9   : > { %v595_v24 = vmul.f32 %v3304_v14, %v434_v19  ;;  %v1021_v50 = vadd.f32 %v989_v55, %v825_v8  ;;  %v797_v19 = vmul.f32 %v3306_v15, %v685_v62  ;;  %v603_v40 = vmul.f32 %v3304_v14, %v474_v18 }
  0xca   : > { %v798_v55 = vmul.f32 %v3306_v15, %v3291_v3  ;;  %v799_v18 = vmul.f32 %v3306_v15, %v3250_v45  ;;  %v996_v3 = vmul.f32 %v3325_v27, %v3277_v56 }
  0xcb   : > { %v627_v29 = vadd.f32 %v3315_v20, %v595_v24  ;;  %v829_v39 = vadd.f32 %v797_v19, %v633_v28 }
  0xcc   : > { %944 = vperm.xlu1 %2850, %v413_v61   ;;  %v3332_v34 = vpop.permute.xlu1 %483  ;;  %v439_v35 = vpop.permute.xlu0 %438  ;;  %v987_v61 = vmul.f32 %v3325_v27, %v3263_v49 }
  0xcd   : > { %v596_v37 = vmul.f32 %v3304_v14, %v439_v35  ;;  %v823_v38 = vadd.f32 %v791_v22, %v627_v29  ;;  %v3355_v22 = vld [vmem:[%s3109_s23 + $0xd0] sm:$0xff]  ;;  %v1024_v29 = vadd.f32 %v992_v51, %v828_v21  ;;  %v1025_v8 = vadd.f32 %v993_v30, %v829_v39 }
  0xce   : > { %v605_v45 = vmul.f32 %v3304_v14, %v3332_v34 }
  0xcf   : > { %v628_v5 = vadd.f32 %v3315_v20, %v596_v37  ;;  %v1019_v17 = vadd.f32 %v987_v61, %v823_v38  ;;  %v1053_v38 = vmax.f32 %v1021_v50, 0.0  ;;  %v1056_v61 = vmax.f32 %v1024_v29, 0.0 }
  0xd0   : > { %2851 = vset.pattern.permute.xlu1 %v3029_v1  ;;  %v489_v11 = vpop.permute.xlu1 %488  ;;  %v454_v16 = vpop.permute.xlu0 %453  ;;  %v1057_v21 = vmax.f32 %v1025_v8, 0.0 }
  0xd1   : > { %v599_v43 = vmul.f32 %v3304_v14, %v454_v16  ;;  %553 = vperm.xlu1 %2851, %v3240_v41   ;;  %v824_v49 = vadd.f32 %v792_v53, %v628_v5  ;;  %v1051_v52 = vmax.f32 %v1019_v17, 0.0  ;;  %v1084_v5 = vpack.c.bf16 %v1054_v26, %v1053_v38 }
  0xd2   : > { %v635_v16 = vadd.f32 %v3315_v20, %v603_v40 }
  0xd3   : > { %v631_v24 = vadd.f32 %v3315_v20, %v599_v43  ;;  %v1020_v25 = vadd.f32 %v988_v2, %v824_v49 }
  0xd4   : > { %v469_v33 = vpop.permute.xlu0 %468 }
  0xd5   : > { %v827_v62 = vadd.f32 %v795_v6, %v631_v24  ;;  %v602_v35 = vmul.f32 %v3304_v14, %v469_v33  ;;  %563 = vperm.xlu1 %2851, %v3355_v22   ;;  %v697_v36 = vpop.permute.xlu1 %696  ;;  %v1052_v37 = vmax.f32 %v1020_v25, 0.0  ;;  %v831_v24 = vadd.f32 %v799_v18, %v635_v16 }
  0xd6   : > { %v800_v43 = vmul.f32 %v3306_v15, %v697_v36  ;;  %v606_v25 = vmul.f32 %v3304_v14, %v489_v11  ;;  %v637_v36 = vadd.f32 %v3315_v20, %v605_v45 }
  0xd7   : > { %v634_v12 = vadd.f32 %v3315_v20, %v602_v35  ;;  %v1083_v46 = vpack.c.bf16 %v1052_v37, %v1051_v52  ;;  %v1023_v53 = vadd.f32 %v991_v57, %v827_v62  ;;  %v802_v35 = vmul.f32 %v3306_v15, %v3258_v48 }
  0xd8   : > { %v479_v2 = vpop.permute.xlu0 %478  ;;  %v638_v34 = vadd.f32 %v3315_v20, %v606_v25 }
  0xd9   : > { %v830_v10 = vadd.f32 %v798_v55, %v634_v12  ;;  %v604_v42 = vmul.f32 %v3304_v14, %v479_v2  ;;  %568 = vperm.xlu1 %2851, %v3248_v44   ;;  %v701_v54 = vpop.permute.xlu1 %700  ;;  %2644 = vmatprep.mubr.bf16.mxu0 %v1083_v46  ;;  %v1055_v51 = vmax.f32 %v1023_v53, 0.0 }
  0xda   : > { %2645 = vmatmul.mubr.bf16.vlgmr.msra.gmra.mxu0 %v1084_v5  ;;  %v801_v33 = vmul.f32 %v3306_v15, %v701_v54  ;;  %v834_v55 = vadd.f32 %v802_v35, %v638_v34 }
  0xdb   : > { %v636_v49 = vadd.f32 %v3315_v20, %v604_v42  ;;  %v1085_v17 = vpack.c.bf16 %v1056_v61, %v1055_v51  ;;  %v1026_v50 = vadd.f32 %v994_v59, %v830_v10 }
  0xdc   : > { %v494_v19 = vpop.permute.xlu0 %493  ;;  %v833_v59 = vadd.f32 %v801_v33, %v637_v36 }
  0xdd   : > { %v832_v57 = vadd.f32 %v800_v43, %v636_v49  ;;  %2852 = vset.pattern.permute.xlu1 %v3028_v0  ;;  %2648 = vmatprep.mubr.bf16.mxu0 %v1085_v17  ;;  %v1058_v6 = vmax.f32 %v1026_v50, 0.0  ;;  %v607_v18 = vmul.f32 %v3304_v14, %v494_v19  ;;  %v999_v50 = vmul.f32 %v3325_v27, %v3279_v58 }
  0xde   : > { %760 = vperm.xlu1 %2852, %v3175_v23   ;;  %v889_v56 = vpop.permute.xlu1 %888 }
  0xdf   : > { %v995_v26 = vmul.f32 %v3325_v27, %v889_v56  ;;  %v1086_v28 = vpack.c.bf16 %v1058_v6, %v1057_v21  ;;  %v1028_v29 = vadd.f32 %v996_v3, %v832_v57 }
  0xe0   : > { %v509_v30 = vpop.permute.xlu0 %508 }
  0xe1   : > { %v1027_v62 = vadd.f32 %v995_v26, %v831_v24  ;;  %v1060_v37 = vmax.f32 %v1028_v29, 0.0  ;;  %v610_v49 = vmul.f32 %v3304_v14, %v509_v30 }
  0xe2   : > { %764 = vperm.xlu1 %2852, %v3355_v22   ;;  %v897_v23 = vpop.permute.xlu1 %896  ;;  %2649 = vmatmul.mubr.bf16.gmra.mxu0 %v1086_v28 }
  0xe3   : > { %v1059_v11 = vmax.f32 %v1027_v62, 0.0  ;;  %v997_v52 = vmul.f32 %v3325_v27, %v897_v23  ;;  %v642_v57 = vadd.f32 %v3315_v20, %v610_v49  ;;  %v1004_v49 = vmul.f32 %v3325_v27, %v3288_v63 }
  0xe4   : > { %v3394_v38 = vpop.permute.xlu0 %518 }
  0xe5   : > { %v1087_v39 = vpack.c.bf16 %v1060_v37, %v1059_v11  ;;  %v1029_v48 = vadd.f32 %v997_v52, %v833_v59  ;;  %v2868_v11 = vld [vmem:[%s3810_s5 + $0x38] sm:$0xff]  }
  0xe6   : > { %2853 = vset.pattern.permute.xlu1 %v3030_v9  ;;  %v901_v40 = vpop.permute.xlu1 %900  ;;  %2676 = vmatprep.subr.bf16.mxu1 %v2868_v11 }
  0xe7   : > { %v998_v12 = vmul.f32 %v3325_v27, %v901_v40  ;;  %952 = vperm.xlu1 %2853, %v3240_v41   ;;  %2652 = vmatprep.mubr.bf16.mxu0 %v1087_v39  ;;  %v1061_v61 = vmax.f32 %v1029_v48, 0.0  ;;  %v2869_v40 = vld [vmem:[%s3810_s5 + $0x30] sm:$0xff]  }
  0xe8   : > { %v3399_v46 = vpop.permute.xlu0 %533  ;;  %2677 = vmatpush3.bf16.msra.mxu1 %v2868_v11 }
  0xe9   : > { %v1030_v53 = vadd.f32 %v998_v12, %v834_v55  ;;  %2678 = vmatprep.subr.bf16.mxu1 %v2869_v40 }
  0xeb   : > { %v1062_v2 = vmax.f32 %v1030_v53, 0.0  ;;  %960 = vperm.xlu1 %2853, %v3355_v22   ;;  %v499_v5 = vpop.permute.xlu1 %498  ;;  %v421_v22 = vld [vmem:[%s3109_s23 + $0xf0] sm:$0xff]  ;;  %v2872_v53 = vld [vmem:[%s3810_s5 + $0x18] sm:$0xff]  }
  0xec   : > { %v3402_v8 = vpop.permute.xlu0 %548  ;;  %2679 = vmatpush3.bf16.msra.mxu1 %v2869_v40 }
  0xed   : > { %v1088_v10 = vpack.c.bf16 %v1062_v2, %v1061_v61  ;;  %v612_v61 = vmul.f32 %v3304_v14, %v3394_v38 }
  0xef   : > { %964 = vperm.xlu1 %2853, %v3248_v44   ;;  %v504_v42 = vpop.permute.xlu1 %503  ;;  %2653 = vmatmul.mubr.bf16.gmra.mxu0 %v1088_v10  ;;  %v639_v44 = vadd.f32 %v3315_v20, %v607_v18  ;;  %v2873_v18 = vld [vmem:[%s3810_s5 + $0x10] sm:$0xff]  }
  0xf0   : > { %v3405_v54 = vpop.permute.xlu0 %558  ;;  %v609_v24 = vmul.f32 %v3304_v14, %v504_v42 }
  0xf2   : > { %v641_v30 = vadd.f32 %v3315_v20, %v609_v24 }
  0xf3   : > { %2855 = vset.pattern.permute.xlu1 %v3029_v1  ;;  %v608_v1 = vmul.f32 %v3304_v14, %v499_v5  ;;  %v644_v5 = vadd.f32 %v3315_v20, %v612_v61 }
  0xf4   : > { %578 = vperm.xlu1 %2855, %v3256_v47   ;;  %v709_v41 = vpop.permute.xlu1 %708  ;;  %v3409_v51 = vpop.permute.xlu0 %573 }
  0xf5   : > { %v803_v43 = vmul.f32 %v3306_v15, %v709_v41  ;;  %v640_v56 = vadd.f32 %v3315_v20, %v608_v1 }
  0xf7   : > { %v835_v19 = vadd.f32 %v803_v43, %v639_v44  ;;  %v2874_v43 = vld [vmem:[%s3810_s5 + $0x8] sm:$0xff]  }
  0xf8   : > { %583 = vperm.xlu1 %2855, %v421_v22   ;;  %v717_v3 = vpop.permute.xlu1 %716  ;;  %v3413_v16 = vpop.permute.xlu0 %588 }
  0xf9   : > { %v1031_v25 = vadd.f32 %v999_v50, %v835_v19  ;;  %v805_v26 = vmul.f32 %v3306_v15, %v717_v3 }
  0xfb   : > { %v1063_v62 = vmax.f32 %v1031_v25, 0.0  ;;  %v837_v36 = vadd.f32 %v805_v26, %v641_v30 }
  0xfc   : > { %2857 = vset.pattern.permute.xlu1 %v3028_v0  ;;  %v721_v17 = vpop.permute.xlu1 %720  ;;  %v1002_v0 = vmul.f32 %v3325_v27, %v3285_v60 }
  0xfd   : > { %772 = vperm.xlu1 %2857, %v3211_v31   ;;  %v713_v21 = vpop.permute.xlu0 %712  ;;  %v806_v6 = vmul.f32 %v3306_v15, %v721_v17 }
  0xfe   : > { %v804_v45 = vmul.f32 %v3306_v15, %v713_v21 }
  0xff   : > { %v838_v31 = vadd.f32 %v806_v6, %v642_v57 }
 0x100   : > { %v836_v28 = vadd.f32 %v804_v45, %v640_v56  ;;  %v2875_v45 = vld [vmem:[%s3810_s5] sm:$0xff]  }
 0x101   : > { %780 = vperm.xlu1 %2857, %v421_v22   ;;  %v909_v58 = vpop.permute.xlu1 %908  ;;  %v1034_v23 = vadd.f32 %v1002_v0, %v838_v31  ;;  %v725_v41 = vpop.permute.xlu0 %724 }
 0x102   : > { %v1000_v29 = vmul.f32 %v3325_v27, %v909_v58  ;;  %v807_v38 = vmul.f32 %v3306_v15, %v725_v41 }
 0x103   : > { %v1066_v59 = vmax.f32 %v1034_v23, 0.0 }
 0x104   : > { %v1032_v33 = vadd.f32 %v1000_v29, %v836_v28 }
 0x105   : > { %784 = vperm.xlu1 %2857, %v3217_v32   ;;  %v913_v35 = vpop.permute.xlu1 %912  ;;  %v737_v21 = vpop.permute.xlu0 %736 }
 0x106   : > { %v1064_v34 = vmax.f32 %v1032_v33, 0.0  ;;  %v1001_v60 = vmul.f32 %v3325_v27, %v913_v35  ;;  %v810_v0 = vmul.f32 %v3306_v15, %v737_v21 }
 0x108   : > { %v1033_v52 = vadd.f32 %v1001_v60, %v837_v36  ;;  %v1089_v37 = vpack.c.bf16 %v1064_v34, %v1063_v62 }
 0x109   : > { %2859 = vset.pattern.permute.xlu1 %v3030_v9  ;;  %v2870_v9 = vld [vmem:[%s3810_s5 + $0x28] sm:$0xff]   ;;  %v745_v61 = vpop.permute.xlu0 %744 }
 0x10a   : > { %v1065_v39 = vmax.f32 %v1033_v52, 0.0  ;;  %972 = vperm.xlu1 %2859, %v3256_v47   ;;  %v514_v32 = vpop.permute.xlu1 %513  ;;  %2656 = vmatprep.mubr.bf16.mxu0 %v1089_v37  ;;  %v2871_v47 = vld [vmem:[%s3810_s5 + $0x20] sm:$0xff]  }
 0x10b   : > { %2680 = vmatprep.subr.bf16.mxu1 %v2870_v9  ;;  %v611_v10 = vmul.f32 %v3304_v14, %v514_v32 }
 0x10c   : > { %v1090_v48 = vpack.c.bf16 %v1066_v59, %v1065_v39  ;;  %2681 = vmatpush3.bf16.msra.mxu1 %v2870_v9  ;;  %v615_v59 = vmul.f32 %v3304_v14, %v3399_v46 }
 0x10d   : > { %2682 = vmatprep.subr.bf16.mxu1 %v2871_v47  ;;  %v643_v3 = vadd.f32 %v3315_v20, %v611_v10 }
 0x10e   : > { %976 = vperm.xlu1 %2859, %v421_v22   ;;  %v524_v55 = vpop.permute.xlu1 %523  ;;  %2657 = vmatmul.mubr.bf16.gmra.mxu0 %v1090_v48  ;;  %v647_v32 = vadd.f32 %v3315_v20, %v615_v59  ;;  %v1007_v48 = vmul.f32 %v3325_v27, %v3294_v4  ;;  %v1010_v4 = vmul.f32 %v3325_v27, %v3296_v7 }
 0x10f   : > { %v613_v1 = vmul.f32 %v3304_v14, %v524_v55  ;;  %v839_v50 = vadd.f32 %v807_v38, %v643_v3 }
 0x110   : > { %2683 = vmatpush3.bf16.msra.mxu1 %v2871_v47 }
 0x111   : > { %2684 = vmatprep.subr.bf16.mxu1 %v2872_v53  ;;  %v645_v63 = vadd.f32 %v3315_v20, %v613_v1 }
 0x112   : > { %v529_v12 = vpop.permute.xlu1 %528 }
 0x113   : > { %v614_v19 = vmul.f32 %v3304_v14, %v529_v12  ;;  %v618_v12 = vmul.f32 %v3304_v14, %v3402_v8 }
 0x114   : > { %2685 = vmatpush3.bf16.msra.mxu1 %v2872_v53 }
 0x115   : > { %2686 = vmatprep.subr.bf16.mxu1 %v2873_v18  ;;  %v646_v58 = vadd.f32 %v3315_v20, %v614_v19  ;;  %v650_v46 = vadd.f32 %v3315_v20, %v618_v12 }
 0x117   : > { %v729_v2 = vpop.permute.xlu1 %728  ;;  %v842_v62 = vadd.f32 %v810_v0, %v646_v58 }
 0x118   : > { %v808_v42 = vmul.f32 %v3306_v15, %v729_v2  ;;  %2687 = vmatpush3.bf16.msra.mxu1 %v2873_v18 }
 0x119   : > { %2688 = vmatprep.subr.bf16.mxu1 %v2874_v43 }
 0x11a   : > { %v840_v44 = vadd.f32 %v808_v42, %v644_v5  ;;  %v812_v42 = vmul.f32 %v3306_v15, %v745_v61 }
 0x11b   : > { %v733_v22 = vpop.permute.xlu1 %732 }
 0x11c   : > { %v1036_v57 = vadd.f32 %v1004_v49, %v840_v44  ;;  %2689 = vmatpush3.bf16.msra.mxu1 %v2874_v43  ;;  %v809_v56 = vmul.f32 %v3306_v15, %v733_v22 }
 0x11d   : > { %2690 = vmatprep.subr.bf16.mxu1 %v2875_v45 }
 0x11e   : > { %v1068_v26 = vmax.f32 %v1036_v57, 0.0  ;;  %v841_v29 = vadd.f32 %v809_v56, %v645_v63 }
 0x120   : > { %v921_v17 = vpop.permute.xlu1 %920  ;;  %2691 = vmatpush3.bf16.msra.mxu1 %v2875_v45 }
 0x121   : > { %v1003_v6 = vmul.f32 %v3325_v27, %v921_v17 }
 0x123   : > { %v1035_v24 = vadd.f32 %v1003_v6, %v839_v50 }
 0x124   : > { %v929_v25 = vpop.permute.xlu1 %928 }
 0x125   : > { %v1067_v31 = vmax.f32 %v1035_v24, 0.0  ;;  %v1005_v28 = vmul.f32 %v3325_v27, %v929_v25  ;;  %v620_v25 = vmul.f32 %v3304_v14, %v3405_v54 }
 0x127   : > { %v1091_v30 = vpack.c.bf16 %v1068_v26, %v1067_v31  ;;  %v1037_v35 = vadd.f32 %v1005_v28, %v841_v29  ;;  %v652_v26 = vadd.f32 %v3315_v20, %v620_v25  ;;  %v1012_v29 = vmul.f32 %v3325_v27, %v3302_v13 }
 0x128   : > { %v933_v33 = vpop.permute.xlu1 %932 }
 0x129   : > { %v1006_v36 = vmul.f32 %v3325_v27, %v933_v33  ;;  %2660 = vmatprep.mubr.bf16.mxu0 %v1091_v30  ;;  %v1069_v34 = vmax.f32 %v1037_v35, 0.0  ;;  %v757_v30 = vpop.permute.xlu0 %756 }
 0x12b   : > { %v1038_v23 = vadd.f32 %v1006_v36, %v842_v62 }
 0x12d   : > { %v1070_v60 = vmax.f32 %v1038_v23, 0.0  ;;  %v539_v11 = vpop.permute.xlu1 %538  ;;  %v815_v23 = vmul.f32 %v3306_v15, %v757_v30 }
 0x12e   : > { %v616_v53 = vmul.f32 %v3304_v14, %v539_v11 }
 0x12f   : > { %v1092_v52 = vpack.c.bf16 %v1070_v60, %v1069_v34 }
 0x130   : > { %v648_v10 = vadd.f32 %v3315_v20, %v616_v53 }
 0x131   : > { %v544_v37 = vpop.permute.xlu1 %543  ;;  %2661 = vmatmul.mubr.bf16.gmra.mxu0 %v1092_v52  ;;  %v769_v52 = vpop.permute.xlu0 %768 }
 0x132   : > { %v617_v18 = vmul.f32 %v3304_v14, %v544_v37  ;;  %v844_v3 = vadd.f32 %v812_v42, %v648_v10 }
 0x134   : > { %v649_v43 = vadd.f32 %v3315_v20, %v617_v18 }
 0x136   : > { %v741_v39 = vpop.permute.xlu1 %740 }
 0x137   : > { %v811_v40 = vmul.f32 %v3306_v15, %v741_v39 }
 0x139   : > { %v843_v55 = vadd.f32 %v811_v40, %v647_v32  ;;  %v818_v32 = vmul.f32 %v3306_v15, %v769_v52 }
 0x13a   : > { %v749_v9 = vpop.permute.xlu1 %748 }
 0x13b   : > { %v1039_v47 = vadd.f32 %v1007_v48, %v843_v55  ;;  %v813_v38 = vmul.f32 %v3306_v15, %v749_v9 }
 0x13d   : > { %v1071_v17 = vmax.f32 %v1039_v47, 0.0  ;;  %v845_v50 = vadd.f32 %v813_v38, %v649_v43  ;;  %v623_v38 = vmul.f32 %v3304_v14, %v3409_v51 }
 0x13e   : > { %v753_v2 = vpop.permute.xlu1 %752 }
 0x13f   : > { %v814_v5 = vmul.f32 %v3306_v15, %v753_v2 }
 0x141   : > { %v846_v41 = vadd.f32 %v814_v5, %v650_v46 }
 0x143   : > { %v1042_v8 = vadd.f32 %v1010_v4, %v846_v41  ;;  %v941_v22 = vpop.permute.xlu1 %940 }
 0x144   : > { %v1008_v44 = vmul.f32 %v3325_v27, %v941_v22 }
 0x145   : > { %v1074_v6 = vmax.f32 %v1042_v8, 0.0 }
 0x146   : > { %v1040_v49 = vadd.f32 %v1008_v44, %v844_v3  ;;  %v777_v3 = vpop.permute.xlu0 %776 }
 0x147   : > { %v945_v1 = vpop.permute.xlu1 %944 }
 0x148   : > { %v1072_v19 = vmax.f32 %v1040_v49, 0.0  ;;  %v1009_v21 = vmul.f32 %v3325_v27, %v945_v1 }
 0x14a   : > { %v1041_v7 = vadd.f32 %v1009_v21, %v845_v50  ;;  %v1093_v57 = vpack.c.bf16 %v1072_v19, %v1071_v17  ;;  %v969_v1 = vpop.permute.xlu0 %968  ;;  %v655_v17 = vadd.f32 %v3315_v20, %v623_v38  ;;  %v626_v50 = vmul.f32 %v3304_v14, %v3413_v16 }
 0x14c   : > { %v1073_v45 = vmax.f32 %v1041_v7, 0.0  ;;  %v554_v56 = vpop.permute.xlu1 %553  ;;  %2664 = vmatprep.mubr.bf16.mxu0 %v1093_v57  ;;  %v1015_v7 = vmul.f32 %v3325_v27, %v969_v1 }
 0x14d   : > { %v619_v28 = vmul.f32 %v3304_v14, %v554_v56  ;;  %v820_v56 = vmul.f32 %v3306_v15, %v777_v3 }
 0x14e   : > { %v1094_v24 = vpack.c.bf16 %v1074_v6, %v1073_v45  ;;  %v981_v51 = vpop.permute.xlu0 %980  ;;  %v658_v45 = vadd.f32 %v3315_v20, %v626_v50 }
 0x14f   : > { %v651_v36 = vadd.f32 %v3315_v20, %v619_v28 }
 0x150   : > { %v564_v63 = vpop.permute.xlu1 %563  ;;  %2665 = vmatmul.mubr.bf16.gmra.mxu0 %v1094_v24 }
 0x151   : > { %v621_v54 = vmul.f32 %v3304_v14, %v564_v63  ;;  %v847_v60 = vadd.f32 %v815_v23, %v651_v36 }
 0x153   : > { %v653_v39 = vadd.f32 %v3315_v20, %v621_v54 }
 0x154   : > { %v569_v0 = vpop.permute.xlu1 %568 }
 0x155   : > { %v622_v11 = vmul.f32 %v3304_v14, %v569_v0  ;;  %v1018_v0 = vmul.f32 %v3325_v27, %v981_v51 }
 0x157   : > { %v654_v48 = vadd.f32 %v3315_v20, %v622_v11 }
 0x159   : > { %v761_v58 = vpop.permute.xlu1 %760  ;;  %v850_v2 = vadd.f32 %v818_v32, %v654_v48 }
 0x15a   : > { %v816_v31 = vmul.f32 %v3306_v15, %v761_v58 }
 0x15c   : > { %v848_v33 = vadd.f32 %v816_v31, %v652_v26 }
 0x15d   : > { %v765_v62 = vpop.permute.xlu1 %764 }
 0x15e   : > { %v1044_v35 = vadd.f32 %v1012_v29, %v848_v33  ;;  %v817_v59 = vmul.f32 %v3306_v15, %v765_v62 }
 0x160   : > { %v1076_v55 = vmax.f32 %v1044_v35, 0.0  ;;  %v849_v47 = vadd.f32 %v817_v59, %v653_v39 }
 0x162   : > { %v953_v34 = vpop.permute.xlu1 %952 }
 0x163   : > { %v1011_v37 = vmul.f32 %v3325_v27, %v953_v34 }
 0x165   : > { %v1043_v13 = vadd.f32 %v1011_v37, %v847_v60 }
 0x166   : > { %v961_v40 = vpop.permute.xlu1 %960 }
 0x167   : > { %v1075_v9 = vmax.f32 %v1043_v13, 0.0  ;;  %v1013_v12 = vmul.f32 %v3325_v27, %v961_v40 }
 0x169   : > { %v1095_v53 = vpack.c.bf16 %v1076_v55, %v1075_v9  ;;  %v1045_v46 = vadd.f32 %v1013_v12, %v849_v47 }
 0x16a   : > { %v965_v61 = vpop.permute.xlu1 %964 }
 0x16b   : > { %v1014_v5 = vmul.f32 %v3325_v27, %v965_v61  ;;  %2668 = vmatprep.mubr.bf16.mxu0 %v1095_v53  ;;  %v1077_v42 = vmax.f32 %v1045_v46, 0.0 }
 0x16d   : > { %v1046_v10 = vadd.f32 %v1014_v5, %v850_v2 }
 0x16f   : > { %v1078_v4 = vmax.f32 %v1046_v10, 0.0  ;;  %v579_v41 = vpop.permute.xlu1 %578 }
 0x170   : > { %v624_v49 = vmul.f32 %v3304_v14, %v579_v41 }
 0x171   : > { %v1096_v18 = vpack.c.bf16 %v1078_v4, %v1077_v42 }
 0x172   : > { %v656_v57 = vadd.f32 %v3315_v20, %v624_v49 }
 0x173   : > { %v584_v8 = vpop.permute.xlu1 %583  ;;  %2669 = vmatmul.mubr.bf16.gmra.mxu0 %v1096_v18 }
 0x174   : > { %v625_v24 = vmul.f32 %v3304_v14, %v584_v8  ;;  %v852_v26 = vadd.f32 %v820_v56, %v656_v57 }
 0x176   : > { %v657_v28 = vadd.f32 %v3315_v20, %v625_v24  ;;  %v3538_v20 = vld [vmem:[%s3809_s4] ss:$0 sm:$0xff] }
 0x178   : > { %v773_v22 = vpop.permute.xlu1 %772 }
 0x179   : > { %v819_v43 = vmul.f32 %v3306_v15, %v773_v22 }
 0x17b   : > { %v851_v21 = vadd.f32 %v819_v43, %v655_v17 }
 0x17c   : > { %v781_v44 = vpop.permute.xlu1 %780 }
 0x17d   : > { %v1047_v63 = vadd.f32 %v1015_v7, %v851_v21  ;;  %v821_v16 = vmul.f32 %v3306_v15, %v781_v44 }
 0x17f   : > { %v1079_v30 = vmax.f32 %v1047_v63, 0.0  ;;  %v853_v62 = vadd.f32 %v821_v16, %v657_v28 }
 0x180   : > { %v785_v19 = vpop.permute.xlu1 %784 }
 0x181   : > { %v822_v6 = vmul.f32 %v3306_v15, %v785_v19 }
 0x183   : > { %v854_v58 = vadd.f32 %v822_v6, %v658_v45 }
 0x185   : > { %v973_v25 = vpop.permute.xlu1 %972  ;;  %v1050_v35 = vadd.f32 %v1018_v0, %v854_v58 }
 0x186   : > { %v1016_v31 = vmul.f32 %v3325_v27, %v973_v25 }
 0x187   : > { %v1082_v34 = vmax.f32 %v1050_v35, 0.0  ;;  %v2877_v35 = vld [vmem:[%s3812_s7 + $0x30] sm:$0xff]  }
 0x188   : > { %v1048_v29 = vadd.f32 %v1016_v31, %v852_v26  ;;  %v2876_v31 = vld [vmem:[%s3812_s7 + $0x38] sm:$0xff]  }
 0x189   : > { %v977_v33 = vpop.permute.xlu1 %976  ;;  %2724 = vmatprep.subr.bf16.mxu0 %v2876_v31 }
 0x18a   : > { %v1080_v36 = vmax.f32 %v1048_v29, 0.0  ;;  %v1017_v14 = vmul.f32 %v3325_v27, %v977_v33  ;;  %2725 = vmatpush3.bf16.msra.mxu0 %v2876_v31 }
 0x18b   : > { %2726 = vmatprep.subr.bf16.mxu0 %v2877_v35 }
 0x18c   : > { %v1049_v23 = vadd.f32 %v1017_v14, %v853_v62  ;;  %v1097_v54 = vpack.c.bf16 %v1080_v36, %v1079_v30 }
 0x18e   : > { %v1081_v60 = vmax.f32 %v1049_v23, 0.0  ;;  %2672 = vmatprep.mubr.bf16.mxu0 %v1097_v54  ;;  %2727 = vmatpush3.bf16.msra.mxu0 %v2877_v35  ;;  %v2878_v23 = vld [vmem:[%s3812_s7 + $0x28] sm:$0xff]   ;;  %v2879_v54 = vld [vmem:[%s3812_s7 + $0x20] sm:$0xff]  }
 0x18f   : > { %2728 = vmatprep.subr.bf16.mxu0 %v2878_v23 }
 0x190   : > { %v1098_v15 = vpack.c.bf16 %v1082_v34, %v1081_v60  ;;  %v2880_v34 = vld [vmem:[%s3812_s7 + $0x18] sm:$0xff]   ;;  %v2881_v60 = vld [vmem:[%s3812_s7 + $0x10] sm:$0xff]  }
 0x192   : > { %2673 = vmatmul.mubr.bf16.gmra.mxu0 %v1098_v15  ;;  %v2882_v15 = vld [vmem:[%s3812_s7 + $0x8] sm:$0xff]  }
 0x193   : > { %2729 = vmatpush3.bf16.msra.mxu0 %v2878_v23 }
 0x194   : > { %2730 = vmatprep.subr.bf16.mxu0 %v2879_v54 }
 0x197   : > { %2731 = vmatpush3.bf16.msra.mxu0 %v2879_v54  ;;  %v3599_v54 = vld [vmem:[%s3811_s6] ss:$0 sm:$0xff] }
 0x198   : > { %2732 = vmatprep.subr.bf16.mxu0 %v2880_v34 }
 0x19a   : > { %v2646_v11 = vpop.f32.mrf.mxu0 }
 0x19b   : > { %v1213_v27 = vadd.f32 %v2646_v11, %v3538_v20  ;;  %2733 = vmatpush3.bf16.msra.mxu0 %v2880_v34  ;;  %v2883_v11 = vld [vmem:[%s3812_s7] sm:$0xff]  }
 0x19c   : > { %v1204_v52 = vpop.f32.mrf.mxu0  ;;  %2734 = vmatprep.subr.bf16.mxu0 %v2881_v60 }
 0x19d   : > { %v1205_v59 = vadd.f32 %v3538_v20, %v1204_v52  ;;  %v1333_v12 = vmax.f32 %v1213_v27, 0.0 }
 0x19e   : > { %v2647_v37 = vpop.f32.mrf.mxu0 }
 0x19f   : > { %v1216_v13 = vadd.f32 %v2647_v37, %v3538_v20  ;;  %v1331_v55 = vmax.f32 %v1205_v59, 0.0  ;;  %2735 = vmatpush3.bf16.msra.mxu0 %v2881_v60 }
 0x1a0   : > { %v1207_v39 = vpop.f32.mrf.mxu0  ;;  %2736 = vmatprep.subr.bf16.mxu0 %v2882_v15 }
 0x1a1   : > { %v1208_v32 = vadd.f32 %v3538_v20, %v1207_v39  ;;  %v1334_v40 = vmax.f32 %v1216_v13, 0.0 }
 0x1a2   : > { %v2650_v48 = vpop.f32.mrf.mxu0 }
 0x1a3   : > { %v1332_v9 = vmax.f32 %v1208_v32, 0.0  ;;  %v1364_v61 = vpack.c.bf16 %v1334_v40, %v1333_v12  ;;  %v1229_v10 = vadd.f32 %v2650_v48, %v3538_v20  ;;  %2737 = vmatpush3.bf16.msra.mxu0 %v2882_v15 }
 0x1a4   : > { %v1220_v47 = vpop.f32.mrf.mxu0  ;;  %2738 = vmatprep.subr.bf16.mxu0 %v2883_v11 }
 0x1a5   : > { %v1363_v53 = vpack.c.bf16 %v1332_v9, %v1331_v55  ;;  %v1221_v46 = vadd.f32 %v3538_v20, %v1220_v47  ;;  %v1337_v22 = vmax.f32 %v1229_v10, 0.0 }
 0x1a6   : > { %v2651_v2 = vpop.f32.mrf.mxu0 }
 0x1a7   : > { %v1232_v5 = vadd.f32 %v2651_v2, %v3538_v20  ;;  %2692 = vmatprep.mubr.bf16.mxu1 %v1363_v53  ;;  %v1335_v18 = vmax.f32 %v1221_v46, 0.0  ;;  %2739 = vmatpush3.bf16.msra.mxu0 %v2883_v11 }
 0x1a8   : > { %v1223_v42 = vpop.f32.mrf.mxu0  ;;  %2693 = vmatmul.mubr.bf16.vlgmr.msra.gmra.mxu1 %v1364_v61 }
 0x1a9   : > { %v1224_v4 = vadd.f32 %v3538_v20, %v1223_v42  ;;  %v1338_v41 = vmax.f32 %v1232_v5, 0.0 }
 0x1ab   : > { %v1336_v8 = vmax.f32 %v1224_v4, 0.0  ;;  %v1366_v38 = vpack.c.bf16 %v1338_v41, %v1337_v22 }
 0x1ad   : > { %v1365_v3 = vpack.c.bf16 %v1336_v8, %v1335_v18 }
 0x1af   : > { %v2654_v44 = vpop.f32.mrf.mxu0  ;;  %2696 = vmatprep.mubr.bf16.mxu1 %v1365_v3 }
 0x1b0   : > { %2697 = vmatmul.mubr.bf16.gmra.mxu1 %v1366_v38  ;;  %v1245_v50 = vadd.f32 %v2654_v44, %v3538_v20 }
 0x1b1   : > { %v1236_v43 = vpop.f32.mrf.mxu0 }
 0x1b2   : > { %v1237_v1 = vadd.f32 %v3538_v20, %v1236_v43  ;;  %v1341_v51 = vmax.f32 %v1245_v50, 0.0 }
 0x1b3   : > { %v2655_v49 = vpop.f32.mrf.mxu0 }
 0x1b4   : > { %v1248_v17 = vadd.f32 %v2655_v49, %v3538_v20  ;;  %v1339_v57 = vmax.f32 %v1237_v1, 0.0 }
 0x1b5   : > { %v1239_v19 = vpop.f32.mrf.mxu0 }
 0x1b6   : > { %v1240_v21 = vadd.f32 %v3538_v20, %v1239_v19  ;;  %v1342_v7 = vmax.f32 %v1248_v17, 0.0 }
 0x1b8   : > { %v1340_v6 = vmax.f32 %v1240_v21, 0.0  ;;  %v1368_v56 = vpack.c.bf16 %v1342_v7, %v1341_v51 }
 0x1ba   : > { %v1367_v45 = vpack.c.bf16 %v1340_v6, %v1339_v57 }
 0x1bc   : > { %2700 = vmatprep.mubr.bf16.mxu1 %v1367_v45 }
 0x1bd   : > { %2701 = vmatmul.mubr.bf16.gmra.mxu1 %v1368_v56 }
 0x1ce   : > { %v2658_v24 = vpop.f32.mrf.mxu0 }
 0x1cf   : > { %v1261_v58 = vadd.f32 %v2658_v24, %v3538_v20 }
 0x1d0   : > { %v1252_v63 = vpop.f32.mrf.mxu0 }
 0x1d1   : > { %v1253_v25 = vadd.f32 %v3538_v20, %v1252_v63  ;;  %v1345_v62 = vmax.f32 %v1261_v58, 0.0 }
 0x1d2   : > { %v2659_v0 = vpop.f32.mrf.mxu0 }
 0x1d3   : > { %v1264_v16 = vadd.f32 %v2659_v0, %v3538_v20  ;;  %v1343_v30 = vmax.f32 %v1253_v25, 0.0 }
 0x1d4   : > { %v1255_v26 = vpop.f32.mrf.mxu0 }
 0x1d5   : > { %v1256_v28 = vadd.f32 %v3538_v20, %v1255_v26  ;;  %v1346_v29 = vmax.f32 %v1264_v16, 0.0 }
 0x1d7   : > { %v1344_v33 = vmax.f32 %v1256_v28, 0.0  ;;  %v1370_v14 = vpack.c.bf16 %v1346_v29, %v1345_v62 }
 0x1d9   : > { %v1369_v36 = vpack.c.bf16 %v1344_v33, %v1343_v30 }
 0x1db   : > { %2704 = vmatprep.mubr.bf16.mxu1 %v1369_v36 }
 0x1dc   : > { %2705 = vmatmul.mubr.bf16.gmra.mxu1 %v1370_v14 }
 0x1f1   : > { %v2662_v52 = vpop.f32.mrf.mxu0 }
 0x1f2   : > { %v1277_v39 = vadd.f32 %v2662_v52, %v3538_v20 }
 0x1f3   : > { %v1268_v37 = vpop.f32.mrf.mxu0 }
 0x1f4   : > { %v1269_v13 = vadd.f32 %v3538_v20, %v1268_v37  ;;  %v1349_v12 = vmax.f32 %v1277_v39, 0.0 }
 0x1f5   : > { %v2663_v59 = vpop.f32.mrf.mxu0 }
 0x1f6   : > { %v1280_v27 = vadd.f32 %v2663_v59, %v3538_v20  ;;  %v1347_v55 = vmax.f32 %v1269_v13, 0.0 }
 0x1f7   : > { %v1271_v32 = vpop.f32.mrf.mxu0 }
 0x1f8   : > { %v1272_v40 = vadd.f32 %v3538_v20, %v1271_v32  ;;  %v1350_v48 = vmax.f32 %v1280_v27, 0.0 }
 0x1fa   : > { %v1348_v9 = vmax.f32 %v1272_v40, 0.0  ;;  %v1372_v53 = vpack.c.bf16 %v1350_v48, %v1349_v12 }
 0x1fc   : > { %v1371_v47 = vpack.c.bf16 %v1348_v9, %v1347_v55 }
 0x1fe   : > { %2708 = vmatprep.mubr.bf16.mxu1 %v1371_v47 }
 0x1ff   : > { %2709 = vmatmul.mubr.bf16.gmra.mxu1 %v1372_v53 }
 0x210   : > { %v2666_v61 = vpop.f32.mrf.mxu0 }
 0x211   : > { %v1293_v42 = vadd.f32 %v2666_v61, %v3538_v20 }
 0x212   : > { %v1284_v2 = vpop.f32.mrf.mxu0 }
 0x213   : > { %v1285_v5 = vadd.f32 %v3538_v20, %v1284_v2  ;;  %v1353_v3 = vmax.f32 %v1293_v42, 0.0 }
 0x214   : > { %v2667_v46 = vpop.f32.mrf.mxu0 }
 0x215   : > { %v1296_v10 = vadd.f32 %v2667_v46, %v3538_v20  ;;  %v1351_v8 = vmax.f32 %v1285_v5, 0.0 }
 0x216   : > { %v1287_v4 = vpop.f32.mrf.mxu0 }
 0x217   : > { %v1288_v41 = vadd.f32 %v3538_v20, %v1287_v4  ;;  %v1354_v18 = vmax.f32 %v1296_v10, 0.0 }
 0x219   : > { %v1352_v22 = vmax.f32 %v1288_v41, 0.0  ;;  %v1374_v44 = vpack.c.bf16 %v1354_v18, %v1353_v3 }
 0x21b   : > { %v1373_v38 = vpack.c.bf16 %v1352_v22, %v1351_v8 }
 0x21d   : > { %2712 = vmatprep.mubr.bf16.mxu1 %v1373_v38 }
 0x21e   : > { %2713 = vmatmul.mubr.bf16.gmra.mxu1 %v1374_v44 }
 0x233   : > { %v2670_v43 = vpop.f32.mrf.mxu0 }
 0x234   : > { %v1309_v19 = vadd.f32 %v2670_v43, %v3538_v20 }
 0x235   : > { %v1300_v49 = vpop.f32.mrf.mxu0 }
 0x236   : > { %v1301_v17 = vadd.f32 %v3538_v20, %v1300_v49  ;;  %v1357_v45 = vmax.f32 %v1309_v19, 0.0 }
 0x237   : > { %v2671_v1 = vpop.f32.mrf.mxu0 }
 0x238   : > { %v1312_v50 = vadd.f32 %v2671_v1, %v3538_v20  ;;  %v1355_v6 = vmax.f32 %v1301_v17, 0.0 }
 0x239   : > { %v1303_v21 = vpop.f32.mrf.mxu0 }
 0x23a   : > { %v1304_v7 = vadd.f32 %v3538_v20, %v1303_v21  ;;  %v1358_v57 = vmax.f32 %v1312_v50, 0.0 }
 0x23c   : > { %v1356_v51 = vmax.f32 %v1304_v7, 0.0  ;;  %v1376_v24 = vpack.c.bf16 %v1358_v57, %v1357_v45 }
 0x23e   : > { %v1375_v56 = vpack.c.bf16 %v1356_v51, %v1355_v6 }
 0x240   : > { %2716 = vmatprep.mubr.bf16.mxu1 %v1375_v56 }
 0x241   : > { %2717 = vmatmul.mubr.bf16.gmra.mxu1 %v1376_v24 }
 0x252   : > { %v2674_v63 = vpop.f32.mrf.mxu0 }
 0x253   : > { %v1325_v26 = vadd.f32 %v2674_v63, %v3538_v20  ;;  %v2884_v63 = vld [vmem:[%s3814_s9 + $0x38] sm:$0xff]  }
 0x254   : > { %v1316_v0 = vpop.f32.mrf.mxu0  ;;  %2772 = vmatprep.subr.bf16.mxu1 %v2884_v63 }
 0x255   : > { %v1317_v16 = vadd.f32 %v3538_v20, %v1316_v0  ;;  %v1361_v62 = vmax.f32 %v1325_v26, 0.0  ;;  %2773 = vmatpush3.bf16.msra.mxu1 %v2884_v63 }
 0x256   : > { %v2675_v25 = vpop.f32.mrf.mxu0 }
 0x257   : > { %v1328_v58 = vadd.f32 %v2675_v25, %v3538_v20  ;;  %v1359_v30 = vmax.f32 %v1317_v16, 0.0 }
 0x258   : > { %v1319_v31 = vpop.f32.mrf.mxu0 }
 0x259   : > { %v1320_v28 = vadd.f32 %v3538_v20, %v1319_v31  ;;  %v1362_v29 = vmax.f32 %v1328_v58, 0.0  ;;  %v2885_v31 = vld [vmem:[%s3814_s9 + $0x30] sm:$0xff]  }
 0x25a   : > { %2774 = vmatprep.subr.bf16.mxu1 %v2885_v31 }
 0x25b   : > { %v1360_v33 = vmax.f32 %v1320_v28, 0.0  ;;  %v1378_v36 = vpack.c.bf16 %v1362_v29, %v1361_v62  ;;  %2775 = vmatpush3.bf16.msra.mxu1 %v2885_v31  ;;  %v2888_v62 = vld [vmem:[%s3814_s9 + $0x18] sm:$0xff]  }
 0x25d   : > { %v1377_v35 = vpack.c.bf16 %v1360_v33, %v1359_v30  ;;  %v2886_v30 = vld [vmem:[%s3814_s9 + $0x28] sm:$0xff]   ;;  %v2887_v33 = vld [vmem:[%s3814_s9 + $0x20] sm:$0xff]  }
 0x25e   : > { %2776 = vmatprep.subr.bf16.mxu1 %v2886_v30 }
 0x25f   : > { %2720 = vmatprep.mubr.bf16.mxu1 %v1377_v35  ;;  %2777 = vmatpush3.bf16.msra.mxu1 %v2886_v30  ;;  %v2889_v35 = vld [vmem:[%s3814_s9 + $0x10] sm:$0xff]  }
 0x260   : > { %2721 = vmatmul.mubr.bf16.gmra.mxu1 %v1378_v36  ;;  %2778 = vmatprep.subr.bf16.mxu1 %v2887_v33  ;;  %v2890_v36 = vld [vmem:[%s3814_s9 + $0x8] sm:$0xff]  }
 0x263   : > { %2779 = vmatpush3.bf16.msra.mxu1 %v2887_v33  ;;  %v3660_v33 = vld [vmem:[%s3813_s8] ss:$0 sm:$0xff] }
 0x264   : > { %2780 = vmatprep.subr.bf16.mxu1 %v2888_v62 }
 0x267   : > { %2781 = vmatpush3.bf16.msra.mxu1 %v2888_v62 }
 0x268   : > { %v2694_v14 = vpop.f32.mrf.mxu1  ;;  %2782 = vmatprep.subr.bf16.mxu1 %v2889_v35 }
 0x269   : > { %v1493_v15 = vadd.f32 %v2694_v14, %v3599_v54  ;;  %v2891_v14 = vld [vmem:[%s3814_s9] sm:$0xff]  }
 0x26a   : > { %v1484_v23 = vpop.f32.mrf.mxu1 }
 0x26b   : > { %v1485_v60 = vadd.f32 %v3599_v54, %v1484_v23  ;;  %v1613_v39 = vmax.f32 %v1493_v15, 0.0  ;;  %2783 = vmatpush3.bf16.msra.mxu1 %v2889_v35 }
 0x26c   : > { %v2695_v34 = vpop.f32.mrf.mxu1  ;;  %2784 = vmatprep.subr.bf16.mxu1 %v2890_v36 }
 0x26d   : > { %v1496_v20 = vadd.f32 %v2695_v34, %v3599_v54  ;;  %v1611_v13 = vmax.f32 %v1485_v60, 0.0 }
 0x26e   : > { %v1487_v11 = vpop.f32.mrf.mxu1 }
 0x26f   : > { %v1488_v52 = vadd.f32 %v3599_v54, %v1487_v11  ;;  %v1614_v37 = vmax.f32 %v1496_v20, 0.0  ;;  %2785 = vmatpush3.bf16.msra.mxu1 %v2890_v36 }
 0x270   : > { %v2698_v59 = vpop.f32.mrf.mxu1  ;;  %2786 = vmatprep.subr.bf16.mxu1 %v2891_v14 }
 0x271   : > { %v1612_v27 = vmax.f32 %v1488_v52, 0.0  ;;  %v1644_v48 = vpack.c.bf16 %v1614_v37, %v1613_v39  ;;  %v1509_v47 = vadd.f32 %v2698_v59, %v3599_v54 }
 0x272   : > { %v1500_v32 = vpop.f32.mrf.mxu1 }
 0x273   : > { %v1643_v40 = vpack.c.bf16 %v1612_v27, %v1611_v13  ;;  %v1501_v9 = vadd.f32 %v3599_v54, %v1500_v32  ;;  %v1617_v10 = vmax.f32 %v1509_v47, 0.0  ;;  %2787 = vmatpush3.bf16.msra.mxu1 %v2891_v14 }
 0x274   : > { %v2699_v55 = vpop.f32.mrf.mxu1 }
 0x275   : > { %v1512_v12 = vadd.f32 %v2699_v55, %v3599_v54  ;;  %2740 = vmatprep.mubr.bf16.mxu0 %v1643_v40  ;;  %v1615_v46 = vmax.f32 %v1501_v9, 0.0 }
 0x276   : > { %v1503_v53 = vpop.f32.mrf.mxu1  ;;  %2741 = vmatmul.mubr.bf16.vlgmr.msra.gmra.mxu0 %v1644_v48 }
 0x277   : > { %v1504_v61 = vadd.f32 %v3599_v54, %v1503_v53  ;;  %v1618_v2 = vmax.f32 %v1512_v12, 0.0 }
 0x279   : > { %v1616_v5 = vmax.f32 %v1504_v61, 0.0  ;;  %v1646_v4 = vpack.c.bf16 %v1618_v2, %v1617_v10 }
 0x27b   : > { %v1645_v42 = vpack.c.bf16 %v1616_v5, %v1615_v46 }
 0x27d   : > { %v2702_v41 = vpop.f32.mrf.mxu1  ;;  %2744 = vmatprep.mubr.bf16.mxu0 %v1645_v42 }
 0x27e   : > { %2745 = vmatmul.mubr.bf16.gmra.mxu0 %v1646_v4  ;;  %v1525_v38 = vadd.f32 %v2702_v41, %v3599_v54 }
 0x27f   : > { %v1516_v18 = vpop.f32.mrf.mxu1 }
 0x280   : > { %v1517_v22 = vadd.f32 %v3599_v54, %v1516_v18  ;;  %v1621_v50 = vmax.f32 %v1525_v38, 0.0 }
 0x281   : > { %v2703_v8 = vpop.f32.mrf.mxu1 }
 0x282   : > { %v1528_v3 = vadd.f32 %v2703_v8, %v3599_v54  ;;  %v1619_v1 = vmax.f32 %v1517_v22, 0.0 }
 0x283   : > { %v1519_v44 = vpop.f32.mrf.mxu1 }
 0x284   : > { %v1520_v43 = vadd.f32 %v3599_v54, %v1519_v44  ;;  %v1622_v49 = vmax.f32 %v1528_v3, 0.0 }
 0x286   : > { %v1620_v17 = vmax.f32 %v1520_v43, 0.0  ;;  %v1648_v21 = vpack.c.bf16 %v1622_v49, %v1621_v50 }
 0x288   : > { %v1647_v19 = vpack.c.bf16 %v1620_v17, %v1619_v1 }
 0x28a   : > { %2748 = vmatprep.mubr.bf16.mxu0 %v1647_v19 }
 0x28b   : > { %2749 = vmatmul.mubr.bf16.gmra.mxu0 %v1648_v21 }
 0x29c   : > { %v2706_v7 = vpop.f32.mrf.mxu1 }
 0x29d   : > { %v1541_v56 = vadd.f32 %v2706_v7, %v3599_v54 }
 0x29e   : > { %v1532_v57 = vpop.f32.mrf.mxu1 }
 0x29f   : > { %v1533_v51 = vadd.f32 %v3599_v54, %v1532_v57  ;;  %v1625_v26 = vmax.f32 %v1541_v56, 0.0 }
 0x2a0   : > { %v2707_v6 = vpop.f32.mrf.mxu1 }
 0x2a1   : > { %v1544_v45 = vadd.f32 %v2707_v6, %v3599_v54  ;;  %v1623_v16 = vmax.f32 %v1533_v51, 0.0 }
 0x2a2   : > { %v1535_v24 = vpop.f32.mrf.mxu1 }
 0x2a3   : > { %v1536_v0 = vadd.f32 %v3599_v54, %v1535_v24  ;;  %v1626_v25 = vmax.f32 %v1544_v45, 0.0 }
 0x2a5   : > { %v1624_v58 = vmax.f32 %v1536_v0, 0.0  ;;  %v1650_v29 = vpack.c.bf16 %v1626_v25, %v1625_v26 }
 0x2a7   : > { %v1649_v28 = vpack.c.bf16 %v1624_v58, %v1623_v16 }
 0x2a9   : > { %2752 = vmatprep.mubr.bf16.mxu0 %v1649_v28 }
 0x2aa   : > { %2753 = vmatmul.mubr.bf16.gmra.mxu0 %v1650_v29 }
 0x2bf   : > { %v2710_v23 = vpop.f32.mrf.mxu1 }
 0x2c0   : > { %v1557_v11 = vadd.f32 %v2710_v23, %v3599_v54 }
 0x2c1   : > { %v1548_v34 = vpop.f32.mrf.mxu1 }
 0x2c2   : > { %v1549_v20 = vadd.f32 %v3599_v54, %v1548_v34  ;;  %v1629_v39 = vmax.f32 %v1557_v11, 0.0 }
 0x2c3   : > { %v2711_v60 = vpop.f32.mrf.mxu1 }
 0x2c4   : > { %v1560_v15 = vadd.f32 %v2711_v60, %v3599_v54  ;;  %v1627_v13 = vmax.f32 %v1549_v20, 0.0 }
 0x2c5   : > { %v1551_v52 = vpop.f32.mrf.mxu1 }
 0x2c6   : > { %v1552_v37 = vadd.f32 %v3599_v54, %v1551_v52  ;;  %v1630_v59 = vmax.f32 %v1560_v15, 0.0 }
 0x2c8   : > { %v1628_v27 = vmax.f32 %v1552_v37, 0.0  ;;  %v1652_v40 = vpack.c.bf16 %v1630_v59, %v1629_v39 }
 0x2ca   : > { %v1651_v32 = vpack.c.bf16 %v1628_v27, %v1627_v13 }
 0x2cc   : > { %2756 = vmatprep.mubr.bf16.mxu0 %v1651_v32 }
 0x2cd   : > { %2757 = vmatmul.mubr.bf16.gmra.mxu0 %v1652_v40 }
 0x2de   : > { %v2714_v48 = vpop.f32.mrf.mxu1 }
 0x2df   : > { %v1573_v53 = vadd.f32 %v2714_v48, %v3599_v54 }
 0x2e0   : > { %v1564_v55 = vpop.f32.mrf.mxu1 }
 0x2e1   : > { %v1565_v12 = vadd.f32 %v3599_v54, %v1564_v55  ;;  %v1633_v42 = vmax.f32 %v1573_v53, 0.0 }
 0x2e2   : > { %v2715_v9 = vpop.f32.mrf.mxu1 }
 0x2e3   : > { %v1576_v47 = vadd.f32 %v2715_v9, %v3599_v54  ;;  %v1631_v5 = vmax.f32 %v1565_v12, 0.0 }
 0x2e4   : > { %v1567_v61 = vpop.f32.mrf.mxu1 }
 0x2e5   : > { %v1568_v2 = vadd.f32 %v3599_v54, %v1567_v61  ;;  %v1634_v46 = vmax.f32 %v1576_v47, 0.0 }
 0x2e7   : > { %v1632_v10 = vmax.f32 %v1568_v2, 0.0  ;;  %v1654_v41 = vpack.c.bf16 %v1634_v46, %v1633_v42 }
 0x2e9   : > { %v1653_v4 = vpack.c.bf16 %v1632_v10, %v1631_v5 }
 0x2eb   : > { %2760 = vmatprep.mubr.bf16.mxu0 %v1653_v4 }
 0x2ec   : > { %2761 = vmatmul.mubr.bf16.gmra.mxu0 %v1654_v41 }
 0x301   : > { %v2718_v18 = vpop.f32.mrf.mxu1 }
 0x302   : > { %v1589_v44 = vadd.f32 %v2718_v18, %v3599_v54 }
 0x303   : > { %v1580_v8 = vpop.f32.mrf.mxu1 }
 0x304   : > { %v1581_v3 = vadd.f32 %v3599_v54, %v1580_v8  ;;  %v1637_v19 = vmax.f32 %v1589_v44, 0.0 }
 0x305   : > { %v2719_v22 = vpop.f32.mrf.mxu1 }
 0x306   : > { %v1592_v38 = vadd.f32 %v2719_v22, %v3599_v54  ;;  %v1635_v17 = vmax.f32 %v1581_v3, 0.0 }
 0x307   : > { %v1583_v43 = vpop.f32.mrf.mxu1 }
 0x308   : > { %v1584_v49 = vadd.f32 %v3599_v54, %v1583_v43  ;;  %v1638_v1 = vmax.f32 %v1592_v38, 0.0 }
 0x30a   : > { %v1636_v50 = vmax.f32 %v1584_v49, 0.0  ;;  %v1656_v7 = vpack.c.bf16 %v1638_v1, %v1637_v19 }
 0x30c   : > { %v1655_v21 = vpack.c.bf16 %v1636_v50, %v1635_v17 }
 0x30e   : > { %2764 = vmatprep.mubr.bf16.mxu0 %v1655_v21 }
 0x30f   : > { %2765 = vmatmul.mubr.bf16.gmra.mxu0 %v1656_v7 }
 0x320   : > { %v2722_v57 = vpop.f32.mrf.mxu1 }
 0x321   : > { %v1605_v24 = vadd.f32 %v2722_v57, %v3599_v54 }
 0x322   : > { %v1596_v6 = vpop.f32.mrf.mxu1 }
 0x323   : > { %v1597_v45 = vadd.f32 %v3599_v54, %v1596_v6  ;;  %v1641_v26 = vmax.f32 %v1605_v24, 0.0 }
 0x324   : > { %v2723_v51 = vpop.f32.mrf.mxu1 }
 0x325   : > { %v1608_v56 = vadd.f32 %v2723_v51, %v3599_v54  ;;  %v1639_v16 = vmax.f32 %v1597_v45, 0.0 }
 0x326   : > { %v1599_v63 = vpop.f32.mrf.mxu1 }
 0x327   : > { %v1600_v0 = vadd.f32 %v3599_v54, %v1599_v63  ;;  %v1642_v25 = vmax.f32 %v1608_v56, 0.0 }
 0x329   : > { %v1640_v58 = vmax.f32 %v1600_v0, 0.0  ;;  %v1658_v28 = vpack.c.bf16 %v1642_v25, %v1641_v26 }
 0x32b   : > { %v1657_v31 = vpack.c.bf16 %v1640_v58, %v1639_v16 }
 0x32d   : > { %2768 = vmatprep.mubr.bf16.mxu0 %v1657_v31 }
 0x32e   : > { %2769 = vmatmul.mubr.bf16.gmra.mxu0 %v1658_v28 }
 0x336   : > { %v2742_v29 = vpop.f32.mrf.mxu0 }
 0x337   : > { %v1773_v36 = vadd.f32 %v2742_v29, %v3660_v33 }
 0x338   : > { %v1764_v30 = vpop.f32.mrf.mxu0 }
 0x339   : > { %v1765_v35 = vadd.f32 %v3660_v33, %v1764_v30  ;;  %v1893_v11 = vmax.f32 %v1773_v36, 0.0 }
 0x33a   : > { %v2743_v62 = vpop.f32.mrf.mxu0 }
 0x33b   : > { %v1776_v54 = vadd.f32 %v2743_v62, %v3660_v33  ;;  %v1891_v20 = vmax.f32 %v1765_v35, 0.0 }
 0x33c   : > { %v1767_v14 = vpop.f32.mrf.mxu0 }
 0x33d   : > { %v1768_v23 = vadd.f32 %v3660_v33, %v1767_v14  ;;  %v1894_v34 = vmax.f32 %v1776_v54, 0.0 }
 0x33e   : > { %v2746_v60 = vpop.f32.mrf.mxu0 }
 0x33f   : > { %v1892_v15 = vmax.f32 %v1768_v23, 0.0  ;;  %v1924_v59 = vpack.c.bf16 %v1894_v34, %v1893_v11  ;;  %v1789_v32 = vadd.f32 %v2746_v60, %v3660_v33 }
 0x340   : > { %v1780_v52 = vpop.f32.mrf.mxu0 }
 0x341   : > { %v1923_v37 = vpack.c.bf16 %v1892_v15, %v1891_v20  ;;  %v1781_v27 = vadd.f32 %v3660_v33, %v1780_v52  ;;  %v1897_v47 = vmax.f32 %v1789_v32, 0.0 }
 0x342   : > { %v2747_v13 = vpop.f32.mrf.mxu0 }
 0x343   : > { %v1792_v39 = vadd.f32 %v2747_v13, %v3660_v33  ;;  %2788 = vmatprep.mubr.bf16.mxu1 %v1923_v37  ;;  %v1895_v9 = vmax.f32 %v1781_v27, 0.0 }
 0x344   : > { %v1783_v40 = vpop.f32.mrf.mxu0  ;;  %2789 = vmatmul.mubr.bf16.vlgmr.msra.gmra.mxu1 %v1924_v59 }
 0x345   : > { %v1784_v48 = vadd.f32 %v3660_v33, %v1783_v40  ;;  %v1898_v55 = vmax.f32 %v1792_v39, 0.0 }
 0x347   : > { %v1896_v12 = vmax.f32 %v1784_v48, 0.0  ;;  %v1926_v61 = vpack.c.bf16 %v1898_v55, %v1897_v47 }
 0x349   : > { %v1925_v53 = vpack.c.bf16 %v1896_v12, %v1895_v9 }
 0x34b   : > { %v2750_v2 = vpop.f32.mrf.mxu0  ;;  %2792 = vmatprep.mubr.bf16.mxu1 %v1925_v53 }
 0x34c   : > { %2793 = vmatmul.mubr.bf16.gmra.mxu1 %v1926_v61  ;;  %v1805_v4 = vadd.f32 %v2750_v2, %v3660_v33 }
 0x34d   : > { %v1796_v46 = vpop.f32.mrf.mxu0 }
 0x34e   : > { %v1797_v10 = vadd.f32 %v3660_v33, %v1796_v46  ;;  %v1901_v38 = vmax.f32 %v1805_v4, 0.0 }
 0x34f   : > { %v2751_v5 = vpop.f32.mrf.mxu0 }
 0x350   : > { %v1808_v42 = vadd.f32 %v2751_v5, %v3660_v33  ;;  %v1899_v22 = vmax.f32 %v1797_v10, 0.0 }
 0x351   : > { %v1799_v41 = vpop.f32.mrf.mxu0 }
 0x352   : > { %v1800_v18 = vadd.f32 %v3660_v33, %v1799_v41  ;;  %v1902_v8 = vmax.f32 %v1808_v42, 0.0 }
 0x354   : > { %v1900_v3 = vmax.f32 %v1800_v18, 0.0  ;;  %v1928_v43 = vpack.c.bf16 %v1902_v8, %v1901_v38 }
 0x356   : > { %v1927_v44 = vpack.c.bf16 %v1900_v3, %v1899_v22 }
 0x358   : > { %2796 = vmatprep.mubr.bf16.mxu1 %v1927_v44 }
 0x359   : > { %2797 = vmatmul.mubr.bf16.gmra.mxu1 %v1928_v43 }
 0x36a   : > { %v2754_v49 = vpop.f32.mrf.mxu0 }
 0x36b   : > { %v1821_v21 = vadd.f32 %v2754_v49, %v3660_v33 }
 0x36c   : > { %v1812_v1 = vpop.f32.mrf.mxu0 }
 0x36d   : > { %v1813_v50 = vadd.f32 %v3660_v33, %v1812_v1  ;;  %v1905_v56 = vmax.f32 %v1821_v21, 0.0 }
 0x36e   : > { %v2755_v17 = vpop.f32.mrf.mxu0 }
 0x36f   : > { %v1824_v19 = vadd.f32 %v2755_v17, %v3660_v33  ;;  %v1903_v51 = vmax.f32 %v1813_v50, 0.0 }
 0x370   : > { %v1815_v7 = vpop.f32.mrf.mxu0 }
 0x371   : > { %v1816_v57 = vadd.f32 %v3660_v33, %v1815_v7  ;;  %v1906_v6 = vmax.f32 %v1824_v19, 0.0 }
 0x373   : > { %v1904_v45 = vmax.f32 %v1816_v57, 0.0  ;;  %v1930_v63 = vpack.c.bf16 %v1906_v6, %v1905_v56  ;;  %v3697_v57 = vld [vmem:[%s3815_s10] ss:$0 sm:$0xff] }
 0x375   : > { %v1929_v24 = vpack.c.bf16 %v1904_v45, %v1903_v51 }
 0x377   : > { %2800 = vmatprep.mubr.bf16.mxu1 %v1929_v24 }
 0x378   : > { %2801 = vmatmul.mubr.bf16.gmra.mxu1 %v1930_v63 }
 0x38d   : > { %v2758_v0 = vpop.f32.mrf.mxu0 }
 0x38e   : > { %v1837_v31 = vadd.f32 %v2758_v0, %v3660_v33 }
 0x38f   : > { %v1828_v25 = vpop.f32.mrf.mxu0 }
 0x390   : > { %v1829_v58 = vadd.f32 %v3660_v33, %v1828_v25  ;;  %v1909_v54 = vmax.f32 %v1837_v31, 0.0 }
 0x391   : > { %v2759_v16 = vpop.f32.mrf.mxu0 }
 0x392   : > { %v1840_v26 = vadd.f32 %v2759_v16, %v3660_v33  ;;  %v1907_v62 = vmax.f32 %v1829_v58, 0.0 }
 0x393   : > { %v1831_v28 = vpop.f32.mrf.mxu0 }
 0x394   : > { %v1832_v29 = vadd.f32 %v3660_v33, %v1831_v28  ;;  %v1910_v30 = vmax.f32 %v1840_v26, 0.0 }
 0x396   : > { %v1908_v35 = vmax.f32 %v1832_v29, 0.0  ;;  %v1932_v14 = vpack.c.bf16 %v1910_v30, %v1909_v54 }
 0x398   : > { %v1931_v36 = vpack.c.bf16 %v1908_v35, %v1907_v62 }
 0x39a   : > { %2804 = vmatprep.mubr.bf16.mxu1 %v1931_v36 }
 0x39b   : > { %2805 = vmatmul.mubr.bf16.gmra.mxu1 %v1932_v14 }
 0x3ac   : > { %v2762_v23 = vpop.f32.mrf.mxu0 }
 0x3ad   : > { %v1853_v11 = vadd.f32 %v2762_v23, %v3660_v33 }
 0x3ae   : > { %v1844_v34 = vpop.f32.mrf.mxu0 }
 0x3af   : > { %v1845_v20 = vadd.f32 %v3660_v33, %v1844_v34  ;;  %v1913_v39 = vmax.f32 %v1853_v11, 0.0 }
 0x3b0   : > { %v2763_v60 = vpop.f32.mrf.mxu0 }
 0x3b1   : > { %v1856_v15 = vadd.f32 %v2763_v60, %v3660_v33  ;;  %v1911_v13 = vmax.f32 %v1845_v20, 0.0 }
 0x3b2   : > { %v1847_v52 = vpop.f32.mrf.mxu0 }
 0x3b3   : > { %v1848_v37 = vadd.f32 %v3660_v33, %v1847_v52  ;;  %v1914_v59 = vmax.f32 %v1856_v15, 0.0 }
 0x3b5   : > { %v1912_v27 = vmax.f32 %v1848_v37, 0.0  ;;  %v1934_v40 = vpack.c.bf16 %v1914_v59, %v1913_v39 }
 0x3b7   : > { %v1933_v32 = vpack.c.bf16 %v1912_v27, %v1911_v13 }
 0x3b9   : > { %2808 = vmatprep.mubr.bf16.mxu1 %v1933_v32 }
 0x3ba   : > { %2809 = vmatmul.mubr.bf16.gmra.mxu1 %v1934_v40 }
 0x3cf   : > { %v2766_v48 = vpop.f32.mrf.mxu0 }
 0x3d0   : > { %v1869_v53 = vadd.f32 %v2766_v48, %v3660_v33 }
 0x3d1   : > { %v1860_v55 = vpop.f32.mrf.mxu0 }
 0x3d2   : > { %v1861_v12 = vadd.f32 %v3660_v33, %v1860_v55  ;;  %v1917_v42 = vmax.f32 %v1869_v53, 0.0 }
 0x3d3   : > { %v2767_v9 = vpop.f32.mrf.mxu0 }
 0x3d4   : > { %v1872_v47 = vadd.f32 %v2767_v9, %v3660_v33  ;;  %v1915_v5 = vmax.f32 %v1861_v12, 0.0 }
 0x3d5   : > { %v1863_v61 = vpop.f32.mrf.mxu0 }
 0x3d6   : > { %v1864_v2 = vadd.f32 %v3660_v33, %v1863_v61  ;;  %v1918_v46 = vmax.f32 %v1872_v47, 0.0 }
 0x3d8   : > { %v1916_v10 = vmax.f32 %v1864_v2, 0.0  ;;  %v1936_v41 = vpack.c.bf16 %v1918_v46, %v1917_v42 }
 0x3da   : > { %v1935_v4 = vpack.c.bf16 %v1916_v10, %v1915_v5 }
 0x3dc   : > { %2812 = vmatprep.mubr.bf16.mxu1 %v1935_v4 }
 0x3dd   : > { %2813 = vmatmul.mubr.bf16.gmra.mxu1 %v1936_v41 }
 0x3ee   : > { %v2770_v18 = vpop.f32.mrf.mxu0 }
 0x3ef   : > { %v1885_v44 = vadd.f32 %v2770_v18, %v3660_v33 }
 0x3f0   : > { %v1876_v8 = vpop.f32.mrf.mxu0 }
 0x3f1   : > { %v1877_v3 = vadd.f32 %v3660_v33, %v1876_v8  ;;  %v1921_v19 = vmax.f32 %v1885_v44, 0.0 }
 0x3f2   : > { %v2771_v22 = vpop.f32.mrf.mxu0 }
 0x3f3   : > { %v1888_v38 = vadd.f32 %v2771_v22, %v3660_v33  ;;  %v1919_v17 = vmax.f32 %v1877_v3, 0.0 }
 0x3f4   : > { %v1879_v43 = vpop.f32.mrf.mxu0 }
 0x3f5   : > { %v1880_v49 = vadd.f32 %v3660_v33, %v1879_v43  ;;  %v1922_v1 = vmax.f32 %v1888_v38, 0.0 }
 0x3f7   : > { %v1920_v50 = vmax.f32 %v1880_v49, 0.0  ;;  %v1938_v7 = vpack.c.bf16 %v1922_v1, %v1921_v19 }
 0x3f9   : > { %v1937_v21 = vpack.c.bf16 %v1920_v50, %v1919_v17 }
 0x3fb   : > { %2816 = vmatprep.mubr.bf16.mxu1 %v1937_v21 }
 0x3fc   : > { %2817 = vmatmul.mubr.bf16.gmra.mxu1 %v1938_v7 }
 0x404   : > { %v2790_v6 = vpop.f32.mrf.mxu1 }
 0x405   : > { %v2053_v51 = vadd.f32 %v2790_v6, %v3697_v57 }
 0x406   : > { %v2044_v45 = vpop.f32.mrf.mxu1 }
 0x407   : > { %v2500_v56 = vmul.f32 -1.442695, %v2053_v51  ;;  %v2045_v33 = vadd.f32 %v3697_v57, %v2044_v45 }
 0x408   : > { %v2791_v24 = vpop.f32.mrf.mxu1 }
 0x409   : > { %2892 = vpow2.f32 %v2500_v56  ;;  %v2498_v63 = vmul.f32 -1.442695, %v2045_v33  ;;  %v2056_v0 = vadd.f32 %v2791_v24, %v3697_v57 }
 0x40a   : > { %v2047_v25 = vpop.f32.mrf.mxu1 }
 0x40b   : > { %2894 = vpow2.f32 %v2498_v63  ;;  %v2501_v16 = vmul.f32 -1.442695, %v2056_v0  ;;  %v2048_v58 = vadd.f32 %v3697_v57, %v2047_v25 }
 0x40c   : > { %v2794_v26 = vpop.f32.mrf.mxu1 }
 0x40d   : > { %2896 = vpow2.f32 %v2501_v16  ;;  %v2499_v31 = vmul.f32 -1.442695, %v2048_v58  ;;  %v2069_v28 = vadd.f32 %v2794_v26, %v3697_v57 }
 0x40e   : > { %v2060_v29 = vpop.f32.mrf.mxu1 }
 0x40f   : > { %2898 = vpow2.f32 %v2499_v31  ;;  %v2504_v30 = vmul.f32 -1.442695, %v2069_v28  ;;  %v2061_v62 = vadd.f32 %v3697_v57, %v2060_v29 }
 0x410   : > { %v2795_v35 = vpop.f32.mrf.mxu1 }
 0x411   : > { %2900 = vpow2.f32 %v2504_v30  ;;  %v2502_v54 = vmul.f32 -1.442695, %v2061_v62  ;;  %v2072_v36 = vadd.f32 %v2795_v35, %v3697_v57 }
 0x412   : > { %v2063_v14 = vpop.f32.mrf.mxu1 }
 0x413   : > { %2902 = vpow2.f32 %v2502_v54  ;;  %v2505_v23 = vmul.f32 -1.442695, %v2072_v36  ;;  %v2064_v34 = vadd.f32 %v3697_v57, %v2063_v14 }
 0x415   : > { %2904 = vpow2.f32 %v2505_v23  ;;  %v2503_v60 = vmul.f32 -1.442695, %v2064_v34 }
 0x416   : > { %v2893_v20 = vpop.eup %2892 }
 0x417   : > { %v2269_v15 = vadd.f32 1.0, %v2893_v20  ;;  %2906 = vpow2.f32 %v2503_v60 }
 0x418   : > { %v2895_v11 = vpop.eup %2894 }
 0x419   : > { %2908 = vrcp.f32 %v2269_v15  ;;  %v2267_v52 = vadd.f32 1.0, %v2895_v11  ;;  %v2798_v37 = vpop.f32.mrf.mxu1 }
 0x41a   : > { %v2897_v59 = vpop.eup %2896  ;;  %v2085_v13 = vadd.f32 %v2798_v37, %v3697_v57 }
 0x41b   : > { %2910 = vrcp.f32 %v2267_v52  ;;  %v2270_v27 = vadd.f32 1.0, %v2897_v59  ;;  %v2076_v39 = vpop.f32.mrf.mxu1 }
 0x41c   : > { %v2899_v32 = vpop.eup %2898  ;;  %v2508_v40 = vmul.f32 -1.442695, %v2085_v13  ;;  %v2077_v48 = vadd.f32 %v3697_v57, %v2076_v39 }
 0x41d   : > { %2912 = vrcp.f32 %v2270_v27  ;;  %v2268_v55 = vadd.f32 1.0, %v2899_v32  ;;  %v2799_v9 = vpop.f32.mrf.mxu1 }
 0x41e   : > { %v2901_v12 = vpop.eup %2900  ;;  %2914 = vpow2.f32 %v2508_v40  ;;  %v2506_v47 = vmul.f32 -1.442695, %v2077_v48  ;;  %v2088_v53 = vadd.f32 %v2799_v9, %v3697_v57 }
 0x41f   : > { %2916 = vrcp.f32 %v2268_v55  ;;  %v2273_v61 = vadd.f32 1.0, %v2901_v12  ;;  %v2079_v2 = vpop.f32.mrf.mxu1 }
 0x420   : > { %v2903_v46 = vpop.eup %2902  ;;  %2918 = vpow2.f32 %v2506_v47  ;;  %v2509_v5 = vmul.f32 -1.442695, %v2088_v53  ;;  %v2080_v10 = vadd.f32 %v3697_v57, %v2079_v2 }
 0x421   : > { %2920 = vrcp.f32 %v2273_v61  ;;  %v2271_v42 = vadd.f32 1.0, %v2903_v46 }
 0x422   : > { %v2905_v4 = vpop.eup %2904  ;;  %2922 = vpow2.f32 %v2509_v5  ;;  %v2507_v41 = vmul.f32 -1.442695, %v2080_v10 }
 0x423   : > { %2924 = vrcp.f32 %v2271_v42  ;;  %v2274_v18 = vadd.f32 1.0, %v2905_v4 }
 0x424   : > { %v2907_v8 = vpop.eup %2906  ;;  %2926 = vpow2.f32 %v2507_v41 }
 0x425   : > { %2928 = vrcp.f32 %v2274_v18  ;;  %v2272_v22 = vadd.f32 1.0, %v2907_v8 }
 0x426   : > { %v2909_v3 = vpop.eup %2908 }
 0x427   : > { %2366 = vst.msk [vmem:[%s3716_s22 + $0x10] sm:$0xff] %vm2363_vm0, %v2909_v3  ;;  %2930 = vrcp.f32 %v2272_v22 }
 0x428   : > { %v2911_v38 = vpop.eup %2910 }
 0x429   : > { %2364 = vst.msk [vmem:[%s3716_s22] sm:$0xff] %vm2363_vm0, %v2911_v38 }
 0x42a   : > { %v2913_v44 = vpop.eup %2912 }
 0x42b   : > { %v2915_v43 = vpop.eup %2914  ;;  %2367 = vst.msk [vmem:[%s3716_s22 + $0x18] sm:$0xff] %vm2363_vm0, %v2913_v44 }
 0x42c   : > { %v2917_v49 = vpop.eup %2916  ;;  %v2277_v1 = vadd.f32 1.0, %v2915_v43 }
 0x42d   : > { %v2919_v17 = vpop.eup %2918  ;;  %2365 = vst.msk [vmem:[%s3716_s22 + $0x8] sm:$0xff] %vm2363_vm0, %v2917_v49 }
 0x42e   : > { %v2921_v50 = vpop.eup %2920  ;;  %2932 = vrcp.f32 %v2277_v1  ;;  %v2275_v19 = vadd.f32 1.0, %v2919_v17 }
 0x42f   : > { %v2923_v21 = vpop.eup %2922  ;;  %2370 = vst.msk [vmem:[%s3716_s22 + $0x30] sm:$0xff] %vm2363_vm0, %v2921_v50 }
 0x430   : > { %v2925_v7 = vpop.eup %2924  ;;  %2934 = vrcp.f32 %v2275_v19  ;;  %v2278_v6 = vadd.f32 1.0, %v2923_v21 }
 0x431   : > { %v2927_v51 = vpop.eup %2926  ;;  %2368 = vst.msk [vmem:[%s3716_s22 + $0x20] sm:$0xff] %vm2363_vm0, %v2925_v7 }
 0x432   : > { %v2929_v45 = vpop.eup %2928  ;;  %2936 = vrcp.f32 %v2278_v6  ;;  %v2276_v56 = vadd.f32 1.0, %v2927_v51 }
 0x433   : > { %2371 = vst.msk [vmem:[%s3716_s22 + $0x38] sm:$0xff] %vm2363_vm0, %v2929_v45 }
 0x434   : > { %v2931_v33 = vpop.eup %2930  ;;  %2938 = vrcp.f32 %v2276_v56 }
 0x435   : > { %2369 = vst.msk [vmem:[%s3716_s22 + $0x28] sm:$0xff] %vm2363_vm0, %v2931_v33 }
 0x438   : > { %v2802_v24 = vpop.f32.mrf.mxu1 }
 0x439   : > { %v2101_v63 = vadd.f32 %v2802_v24, %v3697_v57 }
 0x43a   : > { %v2092_v0 = vpop.f32.mrf.mxu1 }
 0x43b   : > { %v2933_v25 = vpop.eup %2932  ;;  %v2512_v16 = vmul.f32 -1.442695, %v2101_v63  ;;  %v2093_v58 = vadd.f32 %v3697_v57, %v2092_v0 }
 0x43c   : > { %2374 = vst.msk [vmem:[%s3716_s22 + $0x50] sm:$0xff] %vm2363_vm0, %v2933_v25  ;;  %v2803_v26 = vpop.f32.mrf.mxu1 }
 0x43d   : > { %v2935_v31 = vpop.eup %2934  ;;  %2940 = vpow2.f32 %v2512_v16  ;;  %v2510_v28 = vmul.f32 -1.442695, %v2093_v58  ;;  %v2104_v29 = vadd.f32 %v2803_v26, %v3697_v57 }
 0x43e   : > { %2372 = vst.msk [vmem:[%s3716_s22 + $0x40] sm:$0xff] %vm2363_vm0, %v2935_v31  ;;  %v2095_v30 = vpop.f32.mrf.mxu1 }
 0x43f   : > { %v2937_v62 = vpop.eup %2936  ;;  %2942 = vpow2.f32 %v2510_v28  ;;  %v2513_v35 = vmul.f32 -1.442695, %v2104_v29  ;;  %v2096_v54 = vadd.f32 %v3697_v57, %v2095_v30 }
 0x440   : > { %2375 = vst.msk [vmem:[%s3716_s22 + $0x58] sm:$0xff] %vm2363_vm0, %v2937_v62 }
 0x441   : > { %v2939_v36 = vpop.eup %2938  ;;  %2944 = vpow2.f32 %v2513_v35  ;;  %v2511_v14 = vmul.f32 -1.442695, %v2096_v54 }
 0x442   : > { %2373 = vst.msk [vmem:[%s3716_s22 + $0x48] sm:$0xff] %vm2363_vm0, %v2939_v36 }
 0x443   : > { %2946 = vpow2.f32 %v2511_v14 }
 0x44a   : > { %v2941_v23 = vpop.eup %2940 }
 0x44b   : > { %v2281_v34 = vadd.f32 1.0, %v2941_v23 }
 0x44c   : > { %v2943_v60 = vpop.eup %2942 }
 0x44d   : > { %2948 = vrcp.f32 %v2281_v34  ;;  %v2279_v20 = vadd.f32 1.0, %v2943_v60 }
 0x44e   : > { %v2945_v15 = vpop.eup %2944 }
 0x44f   : > { %2950 = vrcp.f32 %v2279_v20  ;;  %v2282_v11 = vadd.f32 1.0, %v2945_v15 }
 0x450   : > { %v2947_v52 = vpop.eup %2946 }
 0x451   : > { %2952 = vrcp.f32 %v2282_v11  ;;  %v2280_v37 = vadd.f32 1.0, %v2947_v52 }
 0x453   : > { %2954 = vrcp.f32 %v2280_v37 }
 0x45a   : > { %v2949_v59 = vpop.eup %2948 }
 0x45b   : > { %2378 = vst.msk [vmem:[%s3716_s22 + $0x70] sm:$0xff] %vm2363_vm0, %v2949_v59  ;;  %v2806_v13 = vpop.f32.mrf.mxu1 }
 0x45c   : > { %v2951_v27 = vpop.eup %2950  ;;  %v2117_v39 = vadd.f32 %v2806_v13, %v3697_v57 }
 0x45d   : > { %2376 = vst.msk [vmem:[%s3716_s22 + $0x60] sm:$0xff] %vm2363_vm0, %v2951_v27  ;;  %v2108_v32 = vpop.f32.mrf.mxu1 }
 0x45e   : > { %v2953_v40 = vpop.eup %2952  ;;  %v2516_v48 = vmul.f32 -1.442695, %v2117_v39  ;;  %v2109_v55 = vadd.f32 %v3697_v57, %v2108_v32 }
 0x45f   : > { %2379 = vst.msk [vmem:[%s3716_s22 + $0x78] sm:$0xff] %vm2363_vm0, %v2953_v40  ;;  %v2807_v9 = vpop.f32.mrf.mxu1 }
 0x460   : > { %v2955_v12 = vpop.eup %2954  ;;  %2956 = vpow2.f32 %v2516_v48  ;;  %v2514_v47 = vmul.f32 -1.442695, %v2109_v55  ;;  %v2120_v53 = vadd.f32 %v2807_v9, %v3697_v57 }
 0x461   : > { %2377 = vst.msk [vmem:[%s3716_s22 + $0x68] sm:$0xff] %vm2363_vm0, %v2955_v12  ;;  %v2111_v61 = vpop.f32.mrf.mxu1 }
 0x462   : > { %2958 = vpow2.f32 %v2514_v47  ;;  %v2517_v2 = vmul.f32 -1.442695, %v2120_v53  ;;  %v2112_v46 = vadd.f32 %v3697_v57, %v2111_v61 }
 0x464   : > { %2960 = vpow2.f32 %v2517_v2  ;;  %v2515_v5 = vmul.f32 -1.442695, %v2112_v46 }
 0x466   : > { %2962 = vpow2.f32 %v2515_v5 }
 0x46d   : > { %v2957_v10 = vpop.eup %2956 }
 0x46e   : > { %v2285_v42 = vadd.f32 1.0, %v2957_v10 }
 0x46f   : > { %v2959_v4 = vpop.eup %2958 }
 0x470   : > { %2964 = vrcp.f32 %v2285_v42  ;;  %v2283_v41 = vadd.f32 1.0, %v2959_v4 }
 0x471   : > { %v2961_v18 = vpop.eup %2960 }
 0x472   : > { %2966 = vrcp.f32 %v2283_v41  ;;  %v2286_v8 = vadd.f32 1.0, %v2961_v18 }
 0x473   : > { %v2963_v22 = vpop.eup %2962 }
 0x474   : > { %2968 = vrcp.f32 %v2286_v8  ;;  %v2284_v3 = vadd.f32 1.0, %v2963_v22 }
 0x476   : > { %2970 = vrcp.f32 %v2284_v3 }
 0x47a   : > { %v2810_v38 = vpop.f32.mrf.mxu1 }
 0x47b   : > { %v2133_v44 = vadd.f32 %v2810_v38, %v3697_v57 }
 0x47c   : > { %v2124_v43 = vpop.f32.mrf.mxu1 }
 0x47d   : > { %v2965_v49 = vpop.eup %2964  ;;  %v2520_v1 = vmul.f32 -1.442695, %v2133_v44  ;;  %v2125_v17 = vadd.f32 %v3697_v57, %v2124_v43 }
 0x47e   : > { %2382 = vst.msk [vmem:[%s3716_s22 + $0x90] sm:$0xff] %vm2363_vm0, %v2965_v49  ;;  %v2811_v50 = vpop.f32.mrf.mxu1 }
 0x47f   : > { %v2967_v19 = vpop.eup %2966  ;;  %2972 = vpow2.f32 %v2520_v1  ;;  %v2518_v21 = vmul.f32 -1.442695, %v2125_v17  ;;  %v2136_v7 = vadd.f32 %v2811_v50, %v3697_v57 }
 0x480   : > { %2380 = vst.msk [vmem:[%s3716_s22 + $0x80] sm:$0xff] %vm2363_vm0, %v2967_v19  ;;  %v2127_v6 = vpop.f32.mrf.mxu1 }
 0x481   : > { %v2969_v51 = vpop.eup %2968  ;;  %2974 = vpow2.f32 %v2518_v21  ;;  %v2521_v45 = vmul.f32 -1.442695, %v2136_v7  ;;  %v2128_v56 = vadd.f32 %v3697_v57, %v2127_v6 }
 0x482   : > { %2383 = vst.msk [vmem:[%s3716_s22 + $0x98] sm:$0xff] %vm2363_vm0, %v2969_v51 }
 0x483   : > { %v2971_v33 = vpop.eup %2970  ;;  %2976 = vpow2.f32 %v2521_v45  ;;  %v2519_v24 = vmul.f32 -1.442695, %v2128_v56 }
 0x484   : > { %2381 = vst.msk [vmem:[%s3716_s22 + $0x88] sm:$0xff] %vm2363_vm0, %v2971_v33 }
 0x485   : > { %2978 = vpow2.f32 %v2519_v24 }
 0x48c   : > { %v2973_v63 = vpop.eup %2972 }
 0x48d   : > { %v2289_v0 = vadd.f32 1.0, %v2973_v63 }
 0x48e   : > { %v2975_v25 = vpop.eup %2974 }
 0x48f   : > { %2980 = vrcp.f32 %v2289_v0  ;;  %v2287_v16 = vadd.f32 1.0, %v2975_v25 }
 0x490   : > { %v2977_v58 = vpop.eup %2976 }
 0x491   : > { %2982 = vrcp.f32 %v2287_v16  ;;  %v2290_v26 = vadd.f32 1.0, %v2977_v58 }
 0x492   : > { %v2979_v31 = vpop.eup %2978 }
 0x493   : > { %2984 = vrcp.f32 %v2290_v26  ;;  %v2288_v28 = vadd.f32 1.0, %v2979_v31 }
 0x495   : > { %2986 = vrcp.f32 %v2288_v28 }
 0x49c   : > { %v2981_v29 = vpop.eup %2980 }
 0x49d   : > { %2386 = vst.msk [vmem:[%s3716_s22 + $0xb0] sm:$0xff] %vm2363_vm0, %v2981_v29  ;;  %v2814_v30 = vpop.f32.mrf.mxu1 }
 0x49e   : > { %v2983_v62 = vpop.eup %2982  ;;  %v2149_v35 = vadd.f32 %v2814_v30, %v3697_v57 }
 0x49f   : > { %2384 = vst.msk [vmem:[%s3716_s22 + $0xa0] sm:$0xff] %vm2363_vm0, %v2983_v62  ;;  %v2140_v54 = vpop.f32.mrf.mxu1 }
 0x4a0   : > { %v2985_v36 = vpop.eup %2984  ;;  %v2524_v14 = vmul.f32 -1.442695, %v2149_v35  ;;  %v2141_v23 = vadd.f32 %v3697_v57, %v2140_v54 }
 0x4a1   : > { %2387 = vst.msk [vmem:[%s3716_s22 + $0xb8] sm:$0xff] %vm2363_vm0, %v2985_v36  ;;  %v2815_v34 = vpop.f32.mrf.mxu1 }
 0x4a2   : > { %v2987_v60 = vpop.eup %2986  ;;  %2988 = vpow2.f32 %v2524_v14  ;;  %v2522_v20 = vmul.f32 -1.442695, %v2141_v23  ;;  %v2152_v15 = vadd.f32 %v2815_v34, %v3697_v57 }
 0x4a3   : > { %2385 = vst.msk [vmem:[%s3716_s22 + $0xa8] sm:$0xff] %vm2363_vm0, %v2987_v60  ;;  %v2143_v11 = vpop.f32.mrf.mxu1 }
 0x4a4   : > { %2990 = vpow2.f32 %v2522_v20  ;;  %v2525_v52 = vmul.f32 -1.442695, %v2152_v15  ;;  %v2144_v37 = vadd.f32 %v3697_v57, %v2143_v11 }
 0x4a6   : > { %2992 = vpow2.f32 %v2525_v52  ;;  %v2523_v59 = vmul.f32 -1.442695, %v2144_v37 }
 0x4a8   : > { %2994 = vpow2.f32 %v2523_v59 }
 0x4af   : > { %v2989_v13 = vpop.eup %2988 }
 0x4b0   : > { %v2293_v27 = vadd.f32 1.0, %v2989_v13 }
 0x4b1   : > { %v2991_v39 = vpop.eup %2990 }
 0x4b2   : > { %2996 = vrcp.f32 %v2293_v27  ;;  %v2291_v32 = vadd.f32 1.0, %v2991_v39 }
 0x4b3   : > { %v2993_v40 = vpop.eup %2992 }
 0x4b4   : > { %2998 = vrcp.f32 %v2291_v32  ;;  %v2294_v48 = vadd.f32 1.0, %v2993_v40 }
 0x4b5   : > { %v2995_v55 = vpop.eup %2994 }
 0x4b6   : > { %3000 = vrcp.f32 %v2294_v48  ;;  %v2292_v9 = vadd.f32 1.0, %v2995_v55 }
 0x4b8   : > { %3002 = vrcp.f32 %v2292_v9 }
 0x4bc   : > { %v2818_v12 = vpop.f32.mrf.mxu1 }
 0x4bd   : > { %v2165_v47 = vadd.f32 %v2818_v12, %v3697_v57 }
 0x4be   : > { %v2156_v53 = vpop.f32.mrf.mxu1 }
 0x4bf   : > { %v2997_v61 = vpop.eup %2996  ;;  %v2528_v2 = vmul.f32 -1.442695, %v2165_v47  ;;  %v2157_v46 = vadd.f32 %v3697_v57, %v2156_v53 }
 0x4c0   : > { %2390 = vst.msk [vmem:[%s3716_s22 + $0xd0] sm:$0xff] %vm2363_vm0, %v2997_v61  ;;  %v2819_v5 = vpop.f32.mrf.mxu1 }
 0x4c1   : > { %v2999_v10 = vpop.eup %2998  ;;  %3004 = vpow2.f32 %v2528_v2  ;;  %v2526_v42 = vmul.f32 -1.442695, %v2157_v46  ;;  %v2168_v4 = vadd.f32 %v2819_v5, %v3697_v57 }
 0x4c2   : > { %2388 = vst.msk [vmem:[%s3716_s22 + $0xc0] sm:$0xff] %vm2363_vm0, %v2999_v10  ;;  %v2159_v41 = vpop.f32.mrf.mxu1 }
 0x4c3   : > { %v3001_v18 = vpop.eup %3000  ;;  %3006 = vpow2.f32 %v2526_v42  ;;  %v2529_v8 = vmul.f32 -1.442695, %v2168_v4  ;;  %v2160_v22 = vadd.f32 %v3697_v57, %v2159_v41 }
 0x4c4   : > { %2391 = vst.msk [vmem:[%s3716_s22 + $0xd8] sm:$0xff] %vm2363_vm0, %v3001_v18 }
 0x4c5   : > { %v3003_v3 = vpop.eup %3002  ;;  %3008 = vpow2.f32 %v2529_v8  ;;  %v2527_v38 = vmul.f32 -1.442695, %v2160_v22 }
 0x4c6   : > { %2389 = vst.msk [vmem:[%s3716_s22 + $0xc8] sm:$0xff] %vm2363_vm0, %v3003_v3 }
 0x4c7   : > { %3010 = vpow2.f32 %v2527_v38 }
 0x4ce   : > { %v3005_v44 = vpop.eup %3004 }
 0x4cf   : > { %v2297_v43 = vadd.f32 1.0, %v3005_v44 }
 0x4d0   : > { %v3007_v49 = vpop.eup %3006 }
 0x4d1   : > { %3012 = vrcp.f32 %v2297_v43  ;;  %v2295_v1 = vadd.f32 1.0, %v3007_v49 }
 0x4d2   : > { %v3009_v17 = vpop.eup %3008 }
 0x4d3   : > { %3014 = vrcp.f32 %v2295_v1  ;;  %v2298_v57 = vadd.f32 1.0, %v3009_v17 }
 0x4d4   : > { %v3011_v50 = vpop.eup %3010 }
 0x4d5   : > { %3016 = vrcp.f32 %v2298_v57  ;;  %v2296_v19 = vadd.f32 1.0, %v3011_v50 }
 0x4d7   : > { %3018 = vrcp.f32 %v2296_v19 }
 0x4de   : > { %v3013_v21 = vpop.eup %3012 }
 0x4df   : > { %2394 = vst.msk [vmem:[%s3716_s22 + $0xf0] sm:$0xff] %vm2363_vm0, %v3013_v21 }
 0x4e0   : > { %v3015_v7 = vpop.eup %3014 }
 0x4e1   : > { %2392 = vst.msk [vmem:[%s3716_s22 + $0xe0] sm:$0xff] %vm2363_vm0, %v3015_v7 }
 0x4e2   : > { %v3017_v6 = vpop.eup %3016 }
 0x4e3   : > { %2395 = vst.msk [vmem:[%s3716_s22 + $0xf8] sm:$0xff] %vm2363_vm0, %v3017_v6 }
 0x4e4   : > { %v3019_v51 = vpop.eup %3018 }
 0x4e5   : > { %2393 = vst.msk [vmem:[%s3716_s22 + $0xe8] sm:$0xff] %vm2363_vm0, %v3019_v51 }
 0x4e6 PF: > { %s21_s17 = sadd.s32 1, %s3026_s17  }
 0x4e7   : > { %p18_p4 = scmp.ge.s32.totalorder %s21_s17, 4  }
 0x4e9   :  { %20 = sbr.rel (!%p18_p4) target bundleno = 1 (0x1), region = 94 }

</bundles_post_ra>
